<compile_context>
chip_gen: v7x
topology: tpu7x:2x2x1
jax: 0.10.0
libtpu: 0.0.40
codegen_flags: <defaults>
</compile_context>

<pallas_src>
import jax
import jax.numpy as jnp
from jax.experimental import pallas as pl
from jax.experimental.pallas import tpu as pltpu

_BN_EPS = 1e-5


def conv1x1_bn_kernel(x_ref, w_ref, gamma_ref, beta_ref, o_ref):
    # x_ref:     (Cin, P)        bf16  (same block every grid step -> resident)
    # w_ref:     (tile_cout, Cin) bf16
    # gamma_ref: (tile_cout, 1)  f32
    # beta_ref:  (tile_cout, 1)  f32
    # o_ref:     (tile_cout, P)
    # 1x1 conv == matmul on the MXU; accumulate in f32.
    y = jnp.dot(w_ref[...], x_ref[...], preferred_element_type=jnp.float32)

    # Training-mode BatchNorm2d statistics over all N*H*W positions (the P
    # axis), computed in a single pass: mean = s1/P, var = s2/P - mean^2
    # (biased variance, matching PyTorch's batch-stat forward).
    p = y.shape[1]
    inv_p = 1.0 / p
    s1 = jnp.sum(y, axis=1, keepdims=True)
    s2 = jnp.sum(y * y, axis=1, keepdims=True)
    mean = s1 * inv_p
    var = s2 * inv_p - mean * mean

    # Fold gamma/beta: out = y * scale + shift  (one fused mul-add per element).
    scale = jax.lax.rsqrt(var + _BN_EPS) * gamma_ref[...]
    shift = beta_ref[...] - mean * scale
    o_ref[...] = (y * scale + shift).astype(o_ref.dtype)


def conv1x1_bn(x_nchw, weight, gamma, beta, *, tile_cout=256):
    """x_nchw: (N, Cin, H, W); weight: (Cout, Cin, 1, 1); gamma/beta: (Cout,)."""
    N, Cin, H, W = x_nchw.shape
    Cout = weight.shape[0]
    P = N * H * W

    # Native layouts.  For N == 1 (the module's shape) both reshapes are free
    # (contiguous); only the N > 1 fallback needs a transpose.
    if N == 1:
        xT = x_nchw.reshape(Cin, P)
    else:
        xT = jnp.transpose(x_nchw, (1, 0, 2, 3)).reshape(Cin, P)
    w2d = weight.reshape(Cout, Cin)

    # bf16 matmul operands (halves weight HBM traffic, native MXU dtype);
    # accumulation and BN math remain f32 inside the kernel.
    xT = xT.astype(jnp.bfloat16)
    w2d = w2d.astype(jnp.bfloat16)
    g2d = gamma.reshape(Cout, 1).astype(jnp.float32)
    b2d = beta.reshape(Cout, 1).astype(jnp.float32)

    if Cout % tile_cout != 0:
        tile_cout = Cout
    grid = (Cout // tile_cout,)

    outT = pl.pallas_call(
        conv1x1_bn_kernel,
        out_shape=jax.ShapeDtypeStruct((Cout, P), x_nchw.dtype),
        grid_spec=pltpu.PrefetchScalarGridSpec(
            num_scalar_prefetch=0,
            grid=grid,
            in_specs=[
                pl.BlockSpec((Cin, P), lambda i: (0, 0)),          # x^T (shared)
                pl.BlockSpec((tile_cout, Cin), lambda i: (i, 0)),  # weight tile
                pl.BlockSpec((tile_cout, 1), lambda i: (i, 0)),    # gamma tile
                pl.BlockSpec((tile_cout, 1), lambda i: (i, 0)),    # beta tile
            ],
            out_specs=pl.BlockSpec((tile_cout, P), lambda i: (i, 0)),
        ),
        compiler_params=pltpu.CompilerParams(
            dimension_semantics=("parallel",),
        ),
    )(xT, w2d, g2d, b2d)

    # (Cout, P) -> NCHW.  Free reshape for N == 1.
    if N == 1:
        return outT.reshape(1, Cout, H, W)
    return jnp.transpose(outT.reshape(Cout, N, H, W), (1, 0, 2, 3))


if __name__ == "__main__":
    key = jax.random.PRNGKey(0)
    kx, kw = jax.random.split(key)

    # Shapes implied by the module's forward: x256 is (1, 512, 14, 14).
    N, Cin, H, W, Cout = 1, 512, 14, 14, 1024

    x = jax.random.normal(kx, (N, Cin, H, W), dtype=jnp.float32)

    # Deterministic parameter init (shapes per the module's __init__):
    #   Conv2d(512, 1024, kernel_size=1, bias=False) -> weight (1024, 512, 1, 1)
    #   BatchNorm2d(1024, affine=True)               -> gamma=1, beta=0 defaults
    weight = jax.random.normal(kw, (Cout, Cin, 1, 1), dtype=jnp.float32) * (
        1.0 / jnp.sqrt(Cin)
    )
    gamma = jnp.ones((Cout,), jnp.float32)
    beta = jnp.zeros((Cout,), jnp.float32)

    out = conv1x1_bn(x, weight, gamma, beta)
    jax.block_until_ready(out)
    assert out.shape == (N, Cout, H, W), out.shape

    # Plain-JAX f32 reference (same training-mode BN semantics).
    y_ref = jnp.einsum("nchw,oc->nohw", x, weight[:, :, 0, 0])
    mean = jnp.mean(y_ref, axis=(0, 2, 3), keepdims=True)
    var = jnp.mean((y_ref - mean) ** 2, axis=(0, 2, 3), keepdims=True)
    ref = (y_ref - mean) * jax.lax.rsqrt(var + _BN_EPS) * gamma[None, :, None, None] \
          + beta[None, :, None, None]
    # Tolerance covers the bf16 cast of the matmul operands (f32 accumulation).
    assert jnp.allclose(out, ref, atol=3e-2, rtol=3e-2), \
        float(jnp.max(jnp.abs(out - ref)))

    print("KERNEL_OK")
</pallas_src>

<mosaic_0001>
module attributes {stable_mosaic.version = 11 : i64} {
  func.func @conv1x1_bn_kernel(%arg0: i32, %arg1: memref<512x196xbf16, #tpu.memory_space<vmem>>, %arg2: memref<256x512xbf16, #tpu.memory_space<vmem>>, %arg3: memref<256x1xf32, #tpu.memory_space<vmem>>, %arg4: memref<256x1xf32, #tpu.memory_space<vmem>>, %arg5: memref<256x196xf32, #tpu.memory_space<vmem>>) attributes {dimension_semantics = [#tpu.dimension_semantics<parallel>], iteration_bounds = array<i64: 4>, scalar_prefetch = 0 : i64, scratch_operands = 0 : i64, tpu.core_type = #tpu.core_type<tc>, window_params = [{pipeline_mode = #tpu.pipeline_mode<synchronous>, transform_indices = @transform_0, window_bounds = array<i64: 512, 196>}, {transform_indices = @transform_1, window_bounds = array<i64: 256, 512>}, {transform_indices = @transform_2, window_bounds = array<i64: 256, 1>}, {transform_indices = @transform_3, window_bounds = array<i64: 256, 1>}, {transform_indices = @transform_4, window_bounds = array<i64: 256, 196>}]} {
    %c0 = arith.constant 0 : index
    %c0_0 = arith.constant 0 : index
    %0 = vector.load %arg2[%c0, %c0_0] : memref<256x512xbf16, #tpu.memory_space<vmem>>, vector<256x512xbf16>
    %c0_1 = arith.constant 0 : index
    %c0_2 = arith.constant 0 : index
    %1 = vector.load %arg1[%c0_1, %c0_2] : memref<512x196xbf16, #tpu.memory_space<vmem>>, vector<512x196xbf16>
    %cst = arith.constant dense<0.000000e+00> : vector<256x196xf32>
    %2 = tpu.matmul %0, %1, %cst {dimension_numbers = #tpu.dot_dimension_numbers<[1], [0], [0], [1], [0, 0, 1, 1], [], []>} : vector<256x512xbf16>, vector<512x196xbf16>, vector<256x196xf32> -> vector<256x196xf32>
    %cst_3 = arith.constant dense<0.000000e+00> : vector<256xf32>
    %3 = vector.multi_reduction <add>, %2, %cst_3 [1] : vector<256x196xf32> to vector<256xf32>
    %4 = vector.shape_cast %3 : vector<256xf32> to vector<256x1xf32>
    %5 = arith.mulf %2, %2 : vector<256x196xf32>
    %cst_4 = arith.constant dense<0.000000e+00> : vector<256xf32>
    %6 = vector.multi_reduction <add>, %5, %cst_4 [1] : vector<256x196xf32> to vector<256xf32>
    %7 = vector.shape_cast %6 : vector<256xf32> to vector<256x1xf32>
    %cst_5 = arith.constant 0.00510204071 : f32
    %8 = vector.broadcast %cst_5 : f32 to vector<256x1xf32>
    %9 = arith.mulf %4, %8 : vector<256x1xf32>
    %cst_6 = arith.constant 0.00510204071 : f32
    %10 = vector.broadcast %cst_6 : f32 to vector<256x1xf32>
    %11 = arith.mulf %7, %10 : vector<256x1xf32>
    %12 = arith.mulf %9, %9 : vector<256x1xf32>
    %13 = arith.subf %11, %12 : vector<256x1xf32>
    %cst_7 = arith.constant 9.99999974E-6 : f32
    %14 = vector.broadcast %cst_7 : f32 to vector<256x1xf32>
    %15 = arith.addf %13, %14 : vector<256x1xf32>
    %16 = math.rsqrt %15 : vector<256x1xf32>
    %c0_8 = arith.constant 0 : index
    %c0_9 = arith.constant 0 : index
    %17 = vector.load %arg3[%c0_8, %c0_9] : memref<256x1xf32, #tpu.memory_space<vmem>>, vector<256x1xf32>
    %18 = arith.mulf %16, %17 : vector<256x1xf32>
    %c0_10 = arith.constant 0 : index
    %c0_11 = arith.constant 0 : index
    %19 = vector.load %arg4[%c0_10, %c0_11] : memref<256x1xf32, #tpu.memory_space<vmem>>, vector<256x1xf32>
    %20 = arith.mulf %9, %18 : vector<256x1xf32>
    %21 = arith.subf %19, %20 : vector<256x1xf32>
    %22 = vector.broadcast %18 : vector<256x1xf32> to vector<256x196xf32>
    %23 = arith.mulf %2, %22 : vector<256x196xf32>
    %24 = vector.broadcast %21 : vector<256x1xf32> to vector<256x196xf32>
    %25 = arith.addf %23, %24 : vector<256x196xf32>
    %c0_12 = arith.constant 0 : index
    %c0_13 = arith.constant 0 : index
    %26 = vector.load %arg5[%c0_12, %c0_13] : memref<256x196xf32, #tpu.memory_space<vmem>>, vector<256x196xf32>
    tpu.vector_store %arg5[%c0_12, %c0_13], %25 {strides = array<i32>} : memref<256x196xf32, #tpu.memory_space<vmem>>, vector<256x196xf32>,
    return
  }
  func.func @transform_0(%arg0: i32) -> (i32, i32) {
    %c0_i32 = arith.constant 0 : i32
    %c0_i32_0 = arith.constant 0 : i32
    %c0_i32_1 = arith.constant 0 : i32
    return %c0_i32, %c0_i32_0 : i32, i32
  }
  func.func @transform_1(%arg0: i32) -> (i32, i32) {
    %c0_i32 = arith.constant 0 : i32
    %c0_i32_0 = arith.constant 0 : i32
    return %arg0, %c0_i32 : i32, i32
  }
  func.func @transform_2(%arg0: i32) -> (i32, i32) {
    %c0_i32 = arith.constant 0 : i32
    %c0_i32_0 = arith.constant 0 : i32
    return %arg0, %c0_i32 : i32, i32
  }
  func.func @transform_3(%arg0: i32) -> (i32, i32) {
    %c0_i32 = arith.constant 0 : i32
    %c0_i32_0 = arith.constant 0 : i32
    return %arg0, %c0_i32 : i32, i32
  }
  func.func @transform_4(%arg0: i32) -> (i32, i32) {
    %c0_i32 = arith.constant 0 : i32
    %c0_i32_0 = arith.constant 0 : i32
    return %arg0, %c0_i32 : i32, i32
  }
}

</mosaic_0001>

<bundles_post_ra>
// kernel: tpu_custom_call.1
= control target key start
LH: loop header
LB: loop body
LE: loop exit
PB: predicated region body
PF: predicated region fallthrough
CT: control target
= control target key end

     0   :  { %s3183_s15 = smov 0   ;;  %s4233_s0 = inlined_call_operand.vmem [shape: bf16[512,196], index: 0, kind: input, shape index: {}]   ;;  %s4234_s1 = inlined_call_operand.vmem [shape: bf16[1024,512], index: 1, kind: input, shape index: {}]   ;;  %s4235_s2 = inlined_call_operand.vmem [shape: f32[1024,1], index: 2, kind: input, shape index: {}]   ;;  %s4236_s3 = inlined_call_operand.vmem [shape: f32[1024,1], index: 3, kind: input, shape index: {}]   ;;  %s4237_s4 = inlined_call_operand.vmem [shape: f32[1024,196], index: 4, kind: output, shape index: {}]  }
   0x1 LB: > { %s2671_s16 = sadd.s32 4294967295, %s3155_s15   ;;  %p2675_p0 = scmp.ge.s32.totalorder %s3155_s15, 1  ;;  %s3155_s15 = sphi %s3183_s15, %s14_s15  }
   0x2   : > { %p186_p1 = scmp.lt.s32.totalorder %s3155_s15, 5 }
   0x4   : > { %p187_p2 = pnand %p2675_p0, %p186_p1 }
   0x6   : > { %190 = sbr.rel (%p187_p2) target bundleno = 733 (0x2dd), region = 36 }
   0xd   : > { %v2893_v0 = vld [vmem:[%s4233_s0 + $0x4] ss:$8 sps:$4 sm:$0xff]   ;;  %v2897_v2 = vld [vmem:[%s4233_s0] ss:$8 sps:$4 sm:$0xff]   ;;  %v2899_v4 = vld [vmem:[%s4233_s0 + $0x14] ss:$8 sps:$4 sm:$0xff]  }
   0xe   : > { %v2895_v1 = vld [vmem:[%s4233_s0 + $0x104] ss:$8 sps:$4 sm:$0xff]   ;;  %1018 = vmatprep.subr.bf16.mxu1 %v2893_v0  ;;  %v2898_v3 = vld [vmem:[%s4233_s0 + $0x100] ss:$8 sps:$4 sm:$0xff]   ;;  %v2901_v5 = vld [vmem:[%s4233_s0 + $0x114] ss:$8 sps:$4 sm:$0xff]  }
   0xf   : > { %1211 = vmatprep.subr.bf16.mxu0 %v2895_v1  ;;  %1019 = vmatpush1.bf16.msra.mxu1 %v2897_v2  ;;  %v2903_v6 = vld [vmem:[%s4233_s0 + $0x10] ss:$8 sps:$4 sm:$0xff]   ;;  %v2905_v8 = vld [vmem:[%s4233_s0 + $0x24] ss:$8 sps:$4 sm:$0xff]   ;;  %v2909_v10 = vld [vmem:[%s4233_s0 + $0x20] ss:$8 sps:$4 sm:$0xff]  }
  0x10   : > { %1212 = vmatpush1.bf16.msra.mxu0 %v2898_v3  ;;  %1020 = vmatprep.subr.bf16.mxu1 %v2899_v4  ;;  %v2904_v7 = vld [vmem:[%s4233_s0 + $0x110] ss:$8 sps:$4 sm:$0xff]   ;;  %v2907_v9 = vld [vmem:[%s4233_s0 + $0x124] ss:$8 sps:$4 sm:$0xff]   ;;  %v2910_v11 = vld [vmem:[%s4233_s0 + $0x120] ss:$8 sps:$4 sm:$0xff]  }
  0x11   : > { %1213 = vmatprep.subr.bf16.mxu0 %v2901_v5  ;;  %v2911_v12 = vld [vmem:[%s4233_s0 + $0x34] ss:$8 sps:$4 sm:$0xff]   ;;  %v2915_v14 = vld [vmem:[%s4233_s0 + $0x30] ss:$8 sps:$4 sm:$0xff]   ;;  %v2917_v16 = vld [vmem:[%s4233_s0 + $0x44] ss:$8 sps:$4 sm:$0xff]  }
  0x12   : > { %v2913_v13 = vld [vmem:[%s4233_s0 + $0x134] ss:$8 sps:$4 sm:$0xff]   ;;  %v2916_v15 = vld [vmem:[%s4233_s0 + $0x130] ss:$8 sps:$4 sm:$0xff]   ;;  %v2919_v17 = vld [vmem:[%s4233_s0 + $0x144] ss:$8 sps:$4 sm:$0xff]  }
  0x13   : > { %1021 = vmatpush1.bf16.msra.mxu1 %v2903_v6  ;;  %v2921_v18 = vld [vmem:[%s4233_s0 + $0x40] ss:$8 sps:$4 sm:$0xff]   ;;  %v2923_v20 = vld [vmem:[%s4233_s0 + $0x54] ss:$8 sps:$4 sm:$0xff]   ;;  %v2927_v22 = vld [vmem:[%s4233_s0 + $0x50] ss:$8 sps:$4 sm:$0xff]  }
  0x14   : > { %1214 = vmatpush1.bf16.msra.mxu0 %v2904_v7  ;;  %1022 = vmatprep.subr.bf16.mxu1 %v2905_v8  ;;  %v2922_v19 = vld [vmem:[%s4233_s0 + $0x140] ss:$8 sps:$4 sm:$0xff]   ;;  %v2925_v21 = vld [vmem:[%s4233_s0 + $0x154] ss:$8 sps:$4 sm:$0xff]   ;;  %v2928_v23 = vld [vmem:[%s4233_s0 + $0x150] ss:$8 sps:$4 sm:$0xff]  }
  0x15   : > { %1215 = vmatprep.subr.bf16.mxu0 %v2907_v9  ;;  %v2929_v24 = vld [vmem:[%s4233_s0 + $0x64] ss:$8 sps:$4 sm:$0xff]   ;;  %v2933_v26 = vld [vmem:[%s4233_s0 + $0x60] ss:$8 sps:$4 sm:$0xff]   ;;  %v2935_v28 = vld [vmem:[%s4233_s0 + $0x74] ss:$8 sps:$4 sm:$0xff]  }
  0x16   : > { %v2931_v25 = vld [vmem:[%s4233_s0 + $0x164] ss:$8 sps:$4 sm:$0xff]   ;;  %v2934_v27 = vld [vmem:[%s4233_s0 + $0x160] ss:$8 sps:$4 sm:$0xff]   ;;  %v2937_v29 = vld [vmem:[%s4233_s0 + $0x174] ss:$8 sps:$4 sm:$0xff]  }
  0x17   : > { %1023 = vmatpush1.bf16.msra.mxu1 %v2909_v10  ;;  %s2676_s29 = sshll.u32 %s2671_s16, 5  ;;  %v2939_v30 = vld [vmem:[%s4233_s0 + $0x70] ss:$8 sps:$4 sm:$0xff]   ;;  %v2941_v32 = vld [vmem:[%s4233_s0 + $0x84] ss:$8 sps:$4 sm:$0xff]   ;;  %vm1404_vm0 = vcmask 556032  }
  0x18   : > { %1216 = vmatpush1.bf16.msra.mxu0 %v2910_v11  ;;  %1024 = vmatprep.subr.bf16.mxu1 %v2911_v12  ;;  %v2940_v31 = vld [vmem:[%s4233_s0 + $0x170] ss:$8 sps:$4 sm:$0xff]   ;;  %v2943_v33 = vld [vmem:[%s4233_s0 + $0x184] ss:$8 sps:$4 sm:$0xff]   ;;  %p225_p3 = scmp.lt.s32.totalorder %s2676_s29, 127 }
  0x19   : > { %1217 = vmatprep.subr.bf16.mxu0 %v2913_v13  ;;  %v2945_v34 = vld [vmem:[%s4233_s0 + $0x80] ss:$8 sps:$4 sm:$0xff]   ;;  %v2947_v36 = vld [vmem:[%s4233_s0 + $0x94] ss:$8 sps:$4 sm:$0xff]   ;;  %v2951_v38 = vld [vmem:[%s4233_s0 + $0x90] ss:$8 sps:$4 sm:$0xff]  }
  0x1a   : > { %v2946_v35 = vld [vmem:[%s4233_s0 + $0x180] ss:$8 sps:$4 sm:$0xff]   ;;  %v2949_v37 = vld [vmem:[%s4233_s0 + $0x194] ss:$8 sps:$4 sm:$0xff]   ;;  %s4335_s29 = smov (!%p225_p3, %s2676_s29), 127 }
  0x1b   : > { %1025 = vmatpush1.bf16.msra.mxu1 %v2915_v14  ;;  %v2952_v39 = vld [vmem:[%s4233_s0 + $0x190] ss:$8 sps:$4 sm:$0xff]   ;;  %v2953_v40 = vld [vmem:[%s4233_s0 + $0xa4] ss:$8 sps:$4 sm:$0xff]   ;;  %s2816_s30 = sshll.u32 %s4335_s29, 4 }
  0x1c   : > { %1218 = vmatpush1.bf16.msra.mxu0 %v2916_v15  ;;  %1026 = vmatprep.subr.bf16.mxu1 %v2917_v16  ;;  %v2955_v41 = vld [vmem:[%s4233_s0 + $0x1a4] ss:$8 sps:$4 sm:$0xff]   ;;  %v2957_v42 = vld [vmem:[%s4233_s0 + $0xa0] ss:$8 sps:$4 sm:$0xff]   ;;  %v2959_v44 = vld [vmem:[%s4233_s0 + $0xb4] ss:$8 sps:$4 sm:$0xff]   ;;  %s3336_s12 = scalar_lea.vmem %s4234_s1, %s2816_s30  ;;  %s4071_s17 = scalar_lea.vmem %s4237_s4, %s2816_s30 }
  0x1d   : > { %1219 = vmatprep.subr.bf16.mxu0 %v2919_v17  ;;  %v2958_v43 = vld [vmem:[%s4233_s0 + $0x1a0] ss:$8 sps:$4 sm:$0xff]   ;;  %v2961_v45 = vld [vmem:[%s4233_s0 + $0x1b4] ss:$8 sps:$4 sm:$0xff]   ;;  %v2963_v46 = vld [vmem:[%s4233_s0 + $0xb0] ss:$8 sps:$4 sm:$0xff]  }
  0x1e   : > { %v2964_v47 = vld [vmem:[%s4233_s0 + $0x1b0] ss:$8 sps:$4 sm:$0xff]   ;;  %v2965_v48 = vld [vmem:[%s4233_s0 + $0xc4] ss:$8 sps:$4 sm:$0xff]   ;;  %v2969_v52 = vld [vmem:[%s4233_s0 + $0xc0] ss:$8 sps:$4 sm:$0xff]  }
  0x1f   : > { %1027 = vmatpush1.bf16.msra.mxu1 %v2921_v18  ;;  %v2991_v49 = vld [vmem:[%s3336_s12 + $0x4] ss:$16 sps:$4 sm:$0xff]   ;;  %v2994_v51 = vld [vmem:[%s3336_s12 + $0xc] ss:$16 sps:$4 sm:$0xff]   ;;  %v2970_v53 = vld [vmem:[%s4233_s0 + $0x1c0] ss:$8 sps:$4 sm:$0xff]  }
  0x20   : > { %1220 = vmatpush1.bf16.msra.mxu0 %v2922_v19  ;;  %1028 = vmatprep.subr.bf16.mxu1 %v2923_v20  ;;  %v2967_v50 = vld [vmem:[%s4233_s0 + $0x1c4] ss:$8 sps:$4 sm:$0xff]   ;;  %v2971_v54 = vld [vmem:[%s4233_s0 + $0xd4] ss:$8 sps:$4 sm:$0xff]   ;;  %v2975_v56 = vld [vmem:[%s4233_s0 + $0xd0] ss:$8 sps:$4 sm:$0xff]  }
  0x21   : > { %1221 = vmatprep.subr.bf16.mxu0 %v2925_v21  ;;  %1050 = vmatprep.mubr.bf16.mxu1 %v2991_v49  ;;  %v2973_v55 = vld [vmem:[%s4233_s0 + $0x1d4] ss:$8 sps:$4 sm:$0xff]   ;;  %v2976_v57 = vld [vmem:[%s4233_s0 + $0x1d0] ss:$8 sps:$4 sm:$0xff]   ;;  %v2977_v58 = vld [vmem:[%s4233_s0 + $0xe4] ss:$8 sps:$4 sm:$0xff]  }
  0x22   : > { %1243 = vmatprep.mubr.bf16.mxu0 %v2994_v51  ;;  %v2979_v59 = vld [vmem:[%s4233_s0 + $0x1e4] ss:$8 sps:$4 sm:$0xff]   ;;  %v2981_v60 = vld [vmem:[%s4233_s0 + $0xe0] ss:$8 sps:$4 sm:$0xff]   ;;  %v2983_v62 = vld [vmem:[%s4233_s0 + $0xf4] ss:$8 sps:$4 sm:$0xff]  }
  0x23   : > { %1029 = vmatpush1.bf16.msra.mxu1 %v2927_v22  ;;  %v2982_v61 = vld [vmem:[%s4233_s0 + $0x1e0] ss:$8 sps:$4 sm:$0xff]   ;;  %v2985_v63 = vld [vmem:[%s4233_s0 + $0x1f4] ss:$8 sps:$4 sm:$0xff]   ;;  %v2987_v0 = vld [vmem:[%s4233_s0 + $0xf0] ss:$8 sps:$4 sm:$0xff]  }
  0x24   : > { %1222 = vmatpush1.bf16.msra.mxu0 %v2928_v23  ;;  %1030 = vmatprep.subr.bf16.mxu1 %v2929_v24  ;;  %v2988_v1 = vld [vmem:[%s4233_s0 + $0x1f0] ss:$8 sps:$4 sm:$0xff]   ;;  %v2995_v4 = vld [vmem:[%s3336_s12 + $0x24] ss:$16 sps:$4 sm:$0xff]   ;;  %v2997_v5 = vld [vmem:[%s3336_s12 + $0x2c] ss:$16 sps:$4 sm:$0xff]  }
  0x25   : > { %1223 = vmatprep.subr.bf16.mxu0 %v2931_v25  ;;  %v2989_v2 = vld [vmem:[%s3336_s12] ss:$16 sps:$4 sm:$0xff]   ;;  %v2992_v3 = vld [vmem:[%s3336_s12 + $0x8] ss:$16 sps:$4 sm:$0xff]   ;;  %v3001_v8 = vld [vmem:[%s3336_s12 + $0x44] ss:$16 sps:$4 sm:$0xff]  }
  0x26   : > { %v2999_v6 = vld [vmem:[%s3336_s12 + $0x20] ss:$16 sps:$4 sm:$0xff]   ;;  %v3000_v7 = vld [vmem:[%s3336_s12 + $0x28] ss:$16 sps:$4 sm:$0xff]   ;;  %v3003_v9 = vld [vmem:[%s3336_s12 + $0x4c] ss:$16 sps:$4 sm:$0xff]  }
  0x27   : > { %1031 = vmatpush1.bf16.msra.mxu1 %v2933_v26  ;;  %v3005_v10 = vld [vmem:[%s3336_s12 + $0x40] ss:$16 sps:$4 sm:$0xff]   ;;  %v3006_v11 = vld [vmem:[%s3336_s12 + $0x48] ss:$16 sps:$4 sm:$0xff]   ;;  %v3007_v12 = vld [vmem:[%s3336_s12 + $0x64] ss:$16 sps:$4 sm:$0xff]  }
  0x28   : > { %1224 = vmatpush1.bf16.msra.mxu0 %v2934_v27  ;;  %1032 = vmatprep.subr.bf16.mxu1 %v2935_v28  ;;  %v3009_v13 = vld [vmem:[%s3336_s12 + $0x6c] ss:$16 sps:$4 sm:$0xff]   ;;  %v3011_v14 = vld [vmem:[%s3336_s12 + $0x60] ss:$16 sps:$4 sm:$0xff]   ;;  %v3012_v15 = vld [vmem:[%s3336_s12 + $0x68] ss:$16 sps:$4 sm:$0xff]  }
  0x29   : > { %1225 = vmatprep.subr.bf16.mxu0 %v2937_v29  ;;  %v3013_v16 = vld [vmem:[%s3336_s12 + $0x84] ss:$16 sps:$4 sm:$0xff]   ;;  %v3015_v17 = vld [vmem:[%s3336_s12 + $0x8c] ss:$16 sps:$4 sm:$0xff]   ;;  %v3017_v18 = vld [vmem:[%s3336_s12 + $0x80] ss:$16 sps:$4 sm:$0xff]  }
  0x2a   : > { %v3018_v19 = vld [vmem:[%s3336_s12 + $0x88] ss:$16 sps:$4 sm:$0xff]   ;;  %v3019_v20 = vld [vmem:[%s3336_s12 + $0xa4] ss:$16 sps:$4 sm:$0xff]   ;;  %v3021_v21 = vld [vmem:[%s3336_s12 + $0xac] ss:$16 sps:$4 sm:$0xff]  }
  0x2b   : > { %1033 = vmatpush1.bf16.msra.mxu1 %v2939_v30  ;;  %v3023_v22 = vld [vmem:[%s3336_s12 + $0xa0] ss:$16 sps:$4 sm:$0xff]   ;;  %v3024_v23 = vld [vmem:[%s3336_s12 + $0xa8] ss:$16 sps:$4 sm:$0xff]   ;;  %v3025_v24 = vld [vmem:[%s3336_s12 + $0xc4] ss:$16 sps:$4 sm:$0xff]  }
  0x2c   : > { %1226 = vmatpush1.bf16.msra.mxu0 %v2940_v31  ;;  %1034 = vmatprep.subr.bf16.mxu1 %v2941_v32  ;;  %v3027_v25 = vld [vmem:[%s3336_s12 + $0xcc] ss:$16 sps:$4 sm:$0xff]   ;;  %v3029_v26 = vld [vmem:[%s3336_s12 + $0xc0] ss:$16 sps:$4 sm:$0xff]   ;;  %v3030_v27 = vld [vmem:[%s3336_s12 + $0xc8] ss:$16 sps:$4 sm:$0xff]  }
  0x2d   : > { %1227 = vmatprep.subr.bf16.mxu0 %v2943_v33  ;;  %v3031_v28 = vld [vmem:[%s3336_s12 + $0xe4] ss:$16 sps:$4 sm:$0xff]   ;;  %v3033_v29 = vld [vmem:[%s3336_s12 + $0xec] ss:$16 sps:$4 sm:$0xff]   ;;  %v3035_v30 = vld [vmem:[%s3336_s12 + $0xe0] ss:$16 sps:$4 sm:$0xff]  }
  0x2e   : > { %v3036_v31 = vld [vmem:[%s3336_s12 + $0xe8] ss:$16 sps:$4 sm:$0xff]   ;;  %v3037_v32 = vld [vmem:[%s3336_s12 + $0x104] ss:$16 sps:$4 sm:$0xff]   ;;  %v3039_v33 = vld [vmem:[%s3336_s12 + $0x10c] ss:$16 sps:$4 sm:$0xff]  }
  0x2f   : > { %1035 = vmatpush1.bf16.msra.mxu1 %v2945_v34  ;;  %v3041_v34 = vld [vmem:[%s3336_s12 + $0x100] ss:$16 sps:$4 sm:$0xff]   ;;  %v3063_v49 = vld [vmem:[%s3336_s12 + $0x18c] ss:$16 sps:$4 sm:$0xff]   ;;  %v3066_v51 = vld [vmem:[%s3336_s12 + $0x188] ss:$16 sps:$4 sm:$0xff]  }
  0x30   : > { %1228 = vmatpush1.bf16.msra.mxu0 %v2946_v35  ;;  %1036 = vmatprep.subr.bf16.mxu1 %v2947_v36  ;;  %v3042_v35 = vld [vmem:[%s3336_s12 + $0x108] ss:$16 sps:$4 sm:$0xff]   ;;  %v3043_v36 = vld [vmem:[%s3336_s12 + $0x124] ss:$16 sps:$4 sm:$0xff]  }
  0x31   : > { %1229 = vmatprep.subr.bf16.mxu0 %v2949_v37  ;;  %v3045_v37 = vld [vmem:[%s3336_s12 + $0x12c] ss:$16 sps:$4 sm:$0xff]  }
  0x33   : > { %1037 = vmatpush1.bf16.msra.mxu1 %v2951_v38  ;;  %v3047_v38 = vld [vmem:[%s3336_s12 + $0x120] ss:$16 sps:$4 sm:$0xff]  }
  0x34   : > { %1230 = vmatpush1.bf16.msra.mxu0 %v2952_v39  ;;  %1038 = vmatprep.subr.bf16.mxu1 %v2953_v40  ;;  %v3048_v39 = vld [vmem:[%s3336_s12 + $0x128] ss:$16 sps:$4 sm:$0xff]   ;;  %v3049_v40 = vld [vmem:[%s3336_s12 + $0x144] ss:$16 sps:$4 sm:$0xff]  }
  0x35   : > { %1231 = vmatprep.subr.bf16.mxu0 %v2955_v41  ;;  %v3051_v41 = vld [vmem:[%s3336_s12 + $0x14c] ss:$16 sps:$4 sm:$0xff]  }
  0x37   : > { %1039 = vmatpush1.bf16.msra.mxu1 %v2957_v42  ;;  %v3053_v42 = vld [vmem:[%s3336_s12 + $0x140] ss:$16 sps:$4 sm:$0xff]  }
  0x38   : > { %1232 = vmatpush1.bf16.msra.mxu0 %v2958_v43  ;;  %1040 = vmatprep.subr.bf16.mxu1 %v2959_v44  ;;  %v3054_v43 = vld [vmem:[%s3336_s12 + $0x148] ss:$16 sps:$4 sm:$0xff]   ;;  %v3055_v44 = vld [vmem:[%s3336_s12 + $0x164] ss:$16 sps:$4 sm:$0xff]  }
  0x39   : > { %1233 = vmatprep.subr.bf16.mxu0 %v2961_v45  ;;  %v3057_v45 = vld [vmem:[%s3336_s12 + $0x16c] ss:$16 sps:$4 sm:$0xff]  }
  0x3b   : > { %1041 = vmatpush1.bf16.msra.mxu1 %v2963_v46  ;;  %v3059_v46 = vld [vmem:[%s3336_s12 + $0x160] ss:$16 sps:$4 sm:$0xff]  }
  0x3c   : > { %1234 = vmatpush1.bf16.msra.mxu0 %v2964_v47  ;;  %1042 = vmatprep.subr.bf16.mxu1 %v2965_v48  ;;  %v3060_v47 = vld [vmem:[%s3336_s12 + $0x168] ss:$16 sps:$4 sm:$0xff]   ;;  %v3061_v48 = vld [vmem:[%s3336_s12 + $0x184] ss:$16 sps:$4 sm:$0xff]  }
  0x3d   : > { %1235 = vmatprep.subr.bf16.mxu0 %v2967_v50  ;;  %v3065_v50 = vld [vmem:[%s3336_s12 + $0x180] ss:$16 sps:$4 sm:$0xff]  }
  0x3f   : > { %1043 = vmatpush1.bf16.msra.mxu1 %v2969_v52  ;;  %v3067_v52 = vld [vmem:[%s3336_s12 + $0x1a4] ss:$16 sps:$4 sm:$0xff]  }
  0x40   : > { %1236 = vmatpush1.bf16.msra.mxu0 %v2970_v53  ;;  %1044 = vmatprep.subr.bf16.mxu1 %v2971_v54  ;;  %v3069_v53 = vld [vmem:[%s3336_s12 + $0x1ac] ss:$16 sps:$4 sm:$0xff]   ;;  %v3071_v54 = vld [vmem:[%s3336_s12 + $0x1a0] ss:$16 sps:$4 sm:$0xff]  }
  0x41   : > { %1237 = vmatprep.subr.bf16.mxu0 %v2973_v55  ;;  %v3072_v55 = vld [vmem:[%s3336_s12 + $0x1a8] ss:$16 sps:$4 sm:$0xff]  }
  0x43   : > { %1045 = vmatpush1.bf16.msra.mxu1 %v2975_v56  ;;  %v3073_v56 = vld [vmem:[%s3336_s12 + $0x1c4] ss:$16 sps:$4 sm:$0xff]  }
  0x44   : > { %1238 = vmatpush1.bf16.msra.mxu0 %v2976_v57  ;;  %1046 = vmatprep.subr.bf16.mxu1 %v2977_v58  ;;  %v3075_v57 = vld [vmem:[%s3336_s12 + $0x1cc] ss:$16 sps:$4 sm:$0xff]   ;;  %v3077_v58 = vld [vmem:[%s3336_s12 + $0x1c0] ss:$16 sps:$4 sm:$0xff]  }
  0x45   : > { %1239 = vmatprep.subr.bf16.mxu0 %v2979_v59  ;;  %v3078_v59 = vld [vmem:[%s3336_s12 + $0x1c8] ss:$16 sps:$4 sm:$0xff]  }
  0x47   : > { %1047 = vmatpush1.bf16.msra.mxu1 %v2981_v60  ;;  %v3079_v60 = vld [vmem:[%s3336_s12 + $0x1e4] ss:$16 sps:$4 sm:$0xff]  }
  0x48   : > { %1240 = vmatpush1.bf16.msra.mxu0 %v2982_v61  ;;  %1048 = vmatprep.subr.bf16.mxu1 %v2983_v62  ;;  %v3081_v61 = vld [vmem:[%s3336_s12 + $0x1ec] ss:$16 sps:$4 sm:$0xff]   ;;  %v3083_v62 = vld [vmem:[%s3336_s12 + $0x1e0] ss:$16 sps:$4 sm:$0xff]  }
  0x49   : > { %1241 = vmatprep.subr.bf16.mxu0 %v2985_v63  ;;  %v3084_v63 = vld [vmem:[%s3336_s12 + $0x1e8] ss:$16 sps:$4 sm:$0xff]   ;;  %s2680_s12 = sshll.u32 %s4335_s29, 3 }
  0x4a   : > { %s3853_s9 = scalar_lea.vmem %s4235_s2, %s2680_s12  ;;  %s3870_s16 = scalar_lea.vmem %s4236_s3, %s2680_s12 }
  0x4b   : > { %1049 = vmatpush1.bf16.msra.mxu1 %v2987_v0 }
  0x4c   : > { %1242 = vmatpush1.bf16.msra.mxu0 %v2988_v1 }
  0x4e   : > { %1051 = vmatmul.mubr.bf16.vlgmr.msra.gmra.mrb[0].mxu1 %v2989_v2 }
  0x4f   : > { %1244 = vmatmul.mubr.bf16.vlgmr.msra.gmra.mrb[0].mxu0 %v2992_v3  ;;  %1060 = vmatprep.mubr.bf16.mxu1 %v2995_v4 }
  0x50   : > { %1253 = vmatprep.mubr.bf16.mxu0 %v2997_v5 }
  0x56   : > { %1061 = vmatmul.mubr.bf16.gmra.mrb[4].mxu1 %v2999_v6 }
  0x57   : > { %1254 = vmatmul.mubr.bf16.gmra.mrb[4].mxu0 %v3000_v7  ;;  %1070 = vmatprep.mubr.bf16.mxu1 %v3001_v8 }
  0x58   : > { %1263 = vmatprep.mubr.bf16.mxu0 %v3003_v9 }
  0x5e   : > { %1071 = vmatmul.mubr.bf16.gmra.mrb[8].mxu1 %v3005_v10 }
  0x5f   : > { %1264 = vmatmul.mubr.bf16.gmra.mrb[8].mxu0 %v3006_v11  ;;  %1080 = vmatprep.mubr.bf16.mxu1 %v3007_v12 }
  0x60   : > { %1273 = vmatprep.mubr.bf16.mxu0 %v3009_v13 }
  0x66   : > { %1081 = vmatmul.mubr.bf16.gmra.mrb[12].mxu1 %v3011_v14 }
  0x67   : > { %1274 = vmatmul.mubr.bf16.gmra.mrb[12].mxu0 %v3012_v15  ;;  %1090 = vmatprep.mubr.bf16.mxu1 %v3013_v16 }
  0x68   : > { %1283 = vmatprep.mubr.bf16.mxu0 %v3015_v17 }
  0x6e   : > { %1091 = vmatmul.mubr.bf16.gmra.mrb[16].mxu1 %v3017_v18 }
  0x6f   : > { %1284 = vmatmul.mubr.bf16.gmra.mrb[16].mxu0 %v3018_v19  ;;  %1100 = vmatprep.mubr.bf16.mxu1 %v3019_v20 }
  0x70   : > { %1293 = vmatprep.mubr.bf16.mxu0 %v3021_v21 }
  0x76   : > { %1101 = vmatmul.mubr.bf16.gmra.mrb[20].mxu1 %v3023_v22 }
  0x77   : > { %1294 = vmatmul.mubr.bf16.gmra.mrb[20].mxu0 %v3024_v23  ;;  %1110 = vmatprep.mubr.bf16.mxu1 %v3025_v24 }
  0x78   : > { %1303 = vmatprep.mubr.bf16.mxu0 %v3027_v25 }
  0x7e   : > { %1111 = vmatmul.mubr.bf16.gmra.mrb[24].mxu1 %v3029_v26 }
  0x7f   : > { %1304 = vmatmul.mubr.bf16.gmra.mrb[24].mxu0 %v3030_v27  ;;  %1120 = vmatprep.mubr.bf16.mxu1 %v3031_v28 }
  0x80   : > { %1313 = vmatprep.mubr.bf16.mxu0 %v3033_v29 }
  0x86   : > { %1121 = vmatmul.mubr.bf16.gmra.mrb[28].mxu1 %v3035_v30 }
  0x87   : > { %1314 = vmatmul.mubr.bf16.gmra.mrb[28].mxu0 %v3036_v31  ;;  %1130 = vmatprep.mubr.bf16.mxu1 %v3037_v32 }
  0x88   : > { %1323 = vmatprep.mubr.bf16.mxu0 %v3039_v33 }
  0x8e   : > { %1131 = vmatmul.mubr.bf16.gmra.mrb[32].mxu1 %v3041_v34 }
  0x8f   : > { %1324 = vmatmul.mubr.bf16.gmra.mrb[32].mxu0 %v3042_v35  ;;  %1140 = vmatprep.mubr.bf16.mxu1 %v3043_v36 }
  0x90   : > { %1333 = vmatprep.mubr.bf16.mxu0 %v3045_v37 }
  0x96   : > { %1141 = vmatmul.mubr.bf16.gmra.mrb[36].mxu1 %v3047_v38 }
  0x97   : > { %1334 = vmatmul.mubr.bf16.gmra.mrb[36].mxu0 %v3048_v39  ;;  %1150 = vmatprep.mubr.bf16.mxu1 %v3049_v40 }
  0x98   : > { %1343 = vmatprep.mubr.bf16.mxu0 %v3051_v41 }
  0x9e   : > { %1151 = vmatmul.mubr.bf16.gmra.mrb[40].mxu1 %v3053_v42 }
  0x9f   : > { %1344 = vmatmul.mubr.bf16.gmra.mrb[40].mxu0 %v3054_v43  ;;  %1160 = vmatprep.mubr.bf16.mxu1 %v3055_v44 }
  0xa0   : > { %1353 = vmatprep.mubr.bf16.mxu0 %v3057_v45 }
  0xa6   : > { %1161 = vmatmul.mubr.bf16.gmra.mrb[44].mxu1 %v3059_v46 }
  0xa7   : > { %1354 = vmatmul.mubr.bf16.gmra.mrb[44].mxu0 %v3060_v47  ;;  %1170 = vmatprep.mubr.bf16.mxu1 %v3061_v48 }
  0xa8   : > { %1363 = vmatprep.mubr.bf16.mxu0 %v3063_v49 }
  0xae   : > { %1171 = vmatmul.mubr.bf16.gmra.mrb[48].mxu1 %v3065_v50 }
  0xaf   : > { %1364 = vmatmul.mubr.bf16.gmra.mrb[48].mxu0 %v3066_v51  ;;  %1180 = vmatprep.mubr.bf16.mxu1 %v3067_v52 }
  0xb0   : > { %1373 = vmatprep.mubr.bf16.mxu0 %v3069_v53 }
  0xb6   : > { %1181 = vmatmul.mubr.bf16.gmra.mrb[52].mxu1 %v3071_v54 }
  0xb7   : > { %1374 = vmatmul.mubr.bf16.gmra.mrb[52].mxu0 %v3072_v55  ;;  %1190 = vmatprep.mubr.bf16.mxu1 %v3073_v56 }
  0xb8   : > { %1383 = vmatprep.mubr.bf16.mxu0 %v3075_v57 }
  0xbe   : > { %1191 = vmatmul.mubr.bf16.gmra.mrb[56].mxu1 %v3077_v58 }
  0xbf   : > { %1384 = vmatmul.mubr.bf16.gmra.mrb[56].mxu0 %v3078_v59  ;;  %1200 = vmatprep.mubr.bf16.mxu1 %v3079_v60 }
  0xc0   : > { %1393 = vmatprep.mubr.bf16.mxu0 %v3081_v61 }
  0xc6   : > { %1201 = vmatmul.mubr.bf16.gmra.mrb[60].mxu1 %v3083_v62 }
  0xc7   : > { %1394 = vmatmul.mubr.bf16.gmra.mrb[60].mxu0 %v3084_v63 }
 0x121   : > { %v1052_v0 = vpop.f32.mrb[0].mxu1 }
 0x122   : > { %v1245_v1 = vpop.f32.mrb[0].mxu0  ;;  %v1054_v3 = vpop.f32.mrb[1].mxu1 }
 0x123   : > { %v3459_v2 = vadd.f32 %v1245_v1, %v1052_v0  ;;  %v1247_v4 = vpop.f32.mrb[1].mxu0  ;;  %v1056_v6 = vpop.f32.mrb[2].mxu1 }
 0x124   : > { %v3461_v5 = vadd.f32 %v1247_v4, %v1054_v3  ;;  %v1249_v7 = vpop.f32.mrb[2].mxu0  ;;  %v1058_v9 = vpop.f32.mrb[3].mxu1 }
 0x125   : > { %v3463_v8 = vadd.f32 %v1249_v7, %v1056_v6  ;;  %v1251_v10 = vpop.f32.mrb[3].mxu0  ;;  %v1533_v33 = vmul.f32 %v3459_v2, %v3459_v2 }
 0x126   : > { %v3465_v11 = vadd.f32 %v1251_v10, %v1058_v9  ;;  %v1405_v12 = vsel %vm1404_vm0, %v3461_v5, 0.0  ;;  %v1534_v16 = vmul.f32 %v3461_v5, %v3461_v5 }
 0x127   : > { %v1406_v13 = vadd.f32 %v1405_v12, %v3459_v2  ;;  %v1535_v17 = vmul.f32 %v3463_v8, %v3463_v8 }
 0x128   : > { %v1536_v14 = vmul.f32 %v3465_v11, %v3465_v11  ;;  %v1409_v15 = vsel %vm1404_vm0, %v3465_v11, 0.0  ;;  %v1597_v29 = vsel %vm1404_vm0, %v1534_v16, 0.0 }
 0x129   : > { %1407 = vadd.xlane.f32.xlu0 %v1406_v13  ;;  %v1062_v18 = vpop.f32.mrb[4].mxu1  ;;  %v1410_v25 = vadd.f32 %v1409_v15, %v3463_v8  ;;  %v1598_v38 = vadd.f32 %v1597_v29, %v1533_v33 }
 0x12a   : > { %v1255_v19 = vpop.f32.mrb[4].mxu0  ;;  %v1601_v20 = vsel %vm1404_vm0, %v1536_v14, 0.0  ;;  %v1064_v22 = vpop.f32.mrb[5].mxu1 }
 0x12b   : > { %v3479_v21 = vadd.f32 %v1255_v19, %v1062_v18  ;;  %v1257_v23 = vpop.f32.mrb[5].mxu0  ;;  %v1602_v24 = vadd.f32 %v1601_v20, %v1535_v17  ;;  %v1066_v27 = vpop.f32.mrb[6].mxu1 }
 0x12c   : > { %v3482_v26 = vadd.f32 %v1257_v23, %v1064_v22  ;;  %v1259_v28 = vpop.f32.mrb[6].mxu0  ;;  %v1068_v32 = vpop.f32.mrb[7].mxu1 }
 0x12d   : > { %v3485_v30 = vadd.f32 %v1259_v28, %v1066_v27  ;;  %v1261_v31 = vpop.f32.mrb[7].mxu0  ;;  %1603 = vadd.xlane.f32.xlu1 %v1602_v24  ;;  %1411 = vadd.xlane.f32.xlu0 %v1410_v25  ;;  %v1537_v34 = vmul.f32 %v3479_v21, %v3479_v21 }
 0x12e   : > { %v3491_v35 = vadd.f32 %v1261_v31, %v1068_v32  ;;  %v1413_v36 = vsel %vm1404_vm0, %v3482_v26, 0.0  ;;  %v1538_v37 = vmul.f32 %v3482_v26, %v3482_v26 }
 0x12f   : > { %v1414_v39 = vadd.f32 %v1413_v36, %v3479_v21  ;;  %v1539_v50 = vmul.f32 %v3485_v30, %v3485_v30 }
 0x130   : > { %v1605_v40 = vsel %vm1404_vm0, %v1538_v37, 0.0  ;;  %v1417_v41 = vsel %vm1404_vm0, %v3491_v35, 0.0  ;;  %v1540_v42 = vmul.f32 %v3491_v35, %v3491_v35 }
 0x131   : > { %1599 = vadd.xlane.f32.xlu0 %v1598_v38  ;;  %1415 = vadd.xlane.f32.xlu1 %v1414_v39  ;;  %v1606_v43 = vadd.f32 %v1605_v40, %v1537_v34  ;;  %v1072_v44 = vpop.f32.mrb[8].mxu1  ;;  %v1418_v49 = vadd.f32 %v1417_v41, %v3485_v30 }
 0x132   : > { %v1265_v45 = vpop.f32.mrb[8].mxu0  ;;  %v1074_v47 = vpop.f32.mrb[9].mxu1  ;;  %v1609_v54 = vsel %vm1404_vm0, %v1540_v42, 0.0 }
 0x133   : > { %v3503_v46 = vadd.f32 %v1265_v45, %v1072_v44  ;;  %v1267_v48 = vpop.f32.mrb[9].mxu0  ;;  %v1076_v52 = vpop.f32.mrb[10].mxu1  ;;  %v1610_v62 = vadd.f32 %v1609_v54, %v1539_v50 }
 0x134   : > { %v3508_v51 = vadd.f32 %v1267_v48, %v1074_v47  ;;  %v1269_v53 = vpop.f32.mrb[10].mxu0  ;;  %v1078_v56 = vpop.f32.mrb[11].mxu1 }
 0x135   : > { %1607 = vadd.xlane.f32.xlu0 %v1606_v43  ;;  %1419 = vadd.xlane.f32.xlu1 %v1418_v49  ;;  %v3511_v55 = vadd.f32 %v1269_v53, %v1076_v52  ;;  %v1271_v57 = vpop.f32.mrb[11].mxu0  ;;  %v1541_v58 = vmul.f32 %v3503_v46, %v3503_v46 }
 0x136   : > { %v3515_v59 = vadd.f32 %v1271_v57, %v1078_v56  ;;  %v1421_v60 = vsel %vm1404_vm0, %v3508_v51, 0.0  ;;  %v1542_v61 = vmul.f32 %v3508_v51, %v3508_v51 }
 0x137   : > { %v1422_v63 = vadd.f32 %v1421_v60, %v3503_v46  ;;  %v1543_v7 = vmul.f32 %v3511_v55, %v3511_v55 }
 0x138   : > { %v1613_v0 = vsel %vm1404_vm0, %v1542_v61, 0.0  ;;  %v1425_v1 = vsel %vm1404_vm0, %v3515_v59, 0.0  ;;  %v1544_v3 = vmul.f32 %v3515_v59, %v3515_v59 }
 0x139   : > { %1611 = vadd.xlane.f32.xlu1 %v1610_v62  ;;  %1423 = vadd.xlane.f32.xlu0 %v1422_v63  ;;  %v1614_v4 = vadd.f32 %v1613_v0, %v1541_v58  ;;  %v1426_v6 = vadd.f32 %v1425_v1, %v3511_v55  ;;  %v1082_v9 = vpop.f32.mrb[12].mxu1 }
 0x13a   : > { %v1275_v10 = vpop.f32.mrb[12].mxu0  ;;  %v1617_v12 = vsel %vm1404_vm0, %v1544_v3, 0.0  ;;  %v1084_v14 = vpop.f32.mrb[13].mxu1 }
 0x13b   : > { %v3531_v13 = vadd.f32 %v1275_v10, %v1082_v9  ;;  %v1277_v15 = vpop.f32.mrb[13].mxu0  ;;  %v1086_v17 = vpop.f32.mrb[14].mxu1  ;;  %v1618_v23 = vadd.f32 %v1617_v12, %v1543_v7 }
 0x13c   : > { %v3533_v16 = vadd.f32 %v1277_v15, %v1084_v14  ;;  %v1279_v18 = vpop.f32.mrb[14].mxu0  ;;  %v1088_v20 = vpop.f32.mrb[15].mxu1 }
 0x13d   : > { %1615 = vadd.xlane.f32.xlu0 %v1614_v4  ;;  %1427 = vadd.xlane.f32.xlu1 %v1426_v6  ;;  %v3535_v19 = vadd.f32 %v1279_v18, %v1086_v17  ;;  %v1281_v22 = vpop.f32.mrb[15].mxu0  ;;  %v1545_v24 = vmul.f32 %v3531_v13, %v3531_v13 }
 0x13e   : > { %v3539_v25 = vadd.f32 %v1281_v22, %v1088_v20  ;;  %v1429_v27 = vsel %vm1404_vm0, %v3533_v16, 0.0  ;;  %v1546_v28 = vmul.f32 %v3533_v16, %v3533_v16 }
 0x13f   : > { %v1430_v29 = vadd.f32 %v1429_v27, %v3531_v13  ;;  %v1547_v37 = vmul.f32 %v3535_v19, %v3535_v19 }
 0x140   : > { %v1621_v31 = vsel %vm1404_vm0, %v1546_v28, 0.0  ;;  %v1433_v32 = vsel %vm1404_vm0, %v3539_v25, 0.0  ;;  %v1548_v33 = vmul.f32 %v3539_v25, %v3539_v25 }
 0x141   : > { %1619 = vadd.xlane.f32.xlu1 %v1618_v23  ;;  %1431 = vadd.xlane.f32.xlu0 %v1430_v29  ;;  %v1622_v34 = vadd.f32 %v1621_v31, %v1545_v24  ;;  %v1434_v36 = vadd.f32 %v1433_v32, %v3535_v19  ;;  %v1092_v38 = vpop.f32.mrb[16].mxu1  ;;  %v3157_v31 = vmov 0  }
 0x142   : > { %v1285_v39 = vpop.f32.mrb[16].mxu0  ;;  %v1625_v40 = vsel %vm1404_vm0, %v1548_v33, 0.0  ;;  %v1094_v42 = vpop.f32.mrb[17].mxu1  ;;  %2892 = vset.pattern.permute.xlu1 %v3157_v31  ;;  %2891 = vset.pattern.permute.xlu0 %v3157_v31 }
 0x143   : > { %v3555_v41 = vadd.f32 %v1285_v39, %v1092_v38  ;;  %v1287_v43 = vpop.f32.mrb[17].mxu0  ;;  %v1096_v45 = vpop.f32.mrb[18].mxu1  ;;  %v1626_v52 = vadd.f32 %v1625_v40, %v1547_v37 }
 0x144   : > { %v3557_v44 = vadd.f32 %v1287_v43, %v1094_v42  ;;  %v1289_v47 = vpop.f32.mrb[18].mxu0  ;;  %v1098_v49 = vpop.f32.mrb[19].mxu1 }
 0x145   : > { %1623 = vadd.xlane.f32.xlu0 %v1622_v34  ;;  %1435 = vadd.xlane.f32.xlu1 %v1434_v36  ;;  %v3559_v48 = vadd.f32 %v1289_v47, %v1096_v45  ;;  %v1291_v50 = vpop.f32.mrb[19].mxu0  ;;  %v1549_v53 = vmul.f32 %v3555_v41, %v3555_v41 }
 0x146   : > { %v3563_v54 = vadd.f32 %v1291_v50, %v1098_v49  ;;  %v1437_v56 = vsel %vm1404_vm0, %v3557_v44, 0.0  ;;  %v1550_v57 = vmul.f32 %v3557_v44, %v3557_v44 }
 0x147   : > { %v1438_v58 = vadd.f32 %v1437_v56, %v3555_v41  ;;  %v1551_v1 = vmul.f32 %v3559_v48, %v3559_v48 }
 0x148   : > { %v1629_v60 = vsel %vm1404_vm0, %v1550_v57, 0.0  ;;  %v1441_v61 = vsel %vm1404_vm0, %v3563_v54, 0.0  ;;  %v1552_v62 = vmul.f32 %v3563_v54, %v3563_v54 }
 0x149   : > { %1627 = vadd.xlane.f32.xlu1 %v1626_v52  ;;  %1439 = vadd.xlane.f32.xlu0 %v1438_v58  ;;  %v1630_v63 = vadd.f32 %v1629_v60, %v1549_v53  ;;  %v1442_v0 = vadd.f32 %v1441_v61, %v3559_v48  ;;  %v1102_v3 = vpop.f32.mrb[20].mxu1 }
 0x14a   : > { %v1295_v4 = vpop.f32.mrb[20].mxu0  ;;  %v1633_v6 = vsel %vm1404_vm0, %v1552_v62, 0.0  ;;  %v1104_v9 = vpop.f32.mrb[21].mxu1 }
 0x14b   : > { %v3579_v7 = vadd.f32 %v1295_v4, %v1102_v3  ;;  %v1297_v10 = vpop.f32.mrb[21].mxu0  ;;  %v1106_v14 = vpop.f32.mrb[22].mxu1  ;;  %v1634_v22 = vadd.f32 %v1633_v6, %v1551_v1 }
 0x14c   : > { %v3581_v12 = vadd.f32 %v1297_v10, %v1104_v9  ;;  %v1299_v15 = vpop.f32.mrb[22].mxu0  ;;  %v1108_v18 = vpop.f32.mrb[23].mxu1 }
 0x14d   : > { %1631 = vadd.xlane.f32.xlu0 %v1630_v63  ;;  %1443 = vadd.xlane.f32.xlu1 %v1442_v0  ;;  %v3583_v17 = vadd.f32 %v1299_v15, %v1106_v14  ;;  %v1301_v20 = vpop.f32.mrb[23].mxu0  ;;  %v1553_v23 = vmul.f32 %v3579_v7, %v3579_v7 }
 0x14e   : > { %v3587_v24 = vadd.f32 %v1301_v20, %v1108_v18  ;;  %v1445_v27 = vsel %vm1404_vm0, %v3581_v12, 0.0  ;;  %v1554_v28 = vmul.f32 %v3581_v12, %v3581_v12 }
 0x14f   : > { %v1446_v29 = vadd.f32 %v1445_v27, %v3579_v7  ;;  %v1555_v38 = vmul.f32 %v3583_v17, %v3583_v17 }
 0x150   : > { %v1637_v32 = vsel %vm1404_vm0, %v1554_v28, 0.0  ;;  %v1449_v33 = vsel %vm1404_vm0, %v3587_v24, 0.0  ;;  %v1556_v34 = vmul.f32 %v3587_v24, %v3587_v24 }
 0x151   : > { %1635 = vadd.xlane.f32.xlu1 %v1634_v22  ;;  %1447 = vadd.xlane.f32.xlu0 %v1446_v29  ;;  %v1638_v36 = vadd.f32 %v1637_v32, %v1553_v23  ;;  %v1450_v37 = vadd.f32 %v1449_v33, %v3583_v17  ;;  %v1112_v39 = vpop.f32.mrb[24].mxu1 }
 0x152   : > { %v1305_v40 = vpop.f32.mrb[24].mxu0  ;;  %v1641_v42 = vsel %vm1404_vm0, %v1556_v34, 0.0  ;;  %v1114_v45 = vpop.f32.mrb[25].mxu1 }
 0x153   : > { %v3603_v43 = vadd.f32 %v1305_v40, %v1112_v39  ;;  %v1307_v47 = vpop.f32.mrb[25].mxu0  ;;  %v1116_v50 = vpop.f32.mrb[26].mxu1  ;;  %v1642_v58 = vadd.f32 %v1641_v42, %v1555_v38 }
 0x154   : > { %v3605_v49 = vadd.f32 %v1307_v47, %v1114_v45  ;;  %v1309_v52 = vpop.f32.mrb[26].mxu0  ;;  %v1118_v56 = vpop.f32.mrb[27].mxu1 }
 0x155   : > { %1639 = vadd.xlane.f32.xlu0 %v1638_v36  ;;  %1451 = vadd.xlane.f32.xlu1 %v1450_v37  ;;  %v3607_v53 = vadd.f32 %v1309_v52, %v1116_v50  ;;  %v1311_v57 = vpop.f32.mrb[27].mxu0  ;;  %v1557_v60 = vmul.f32 %v3603_v43, %v3603_v43 }
 0x156   : > { %v3611_v61 = vadd.f32 %v1311_v57, %v1118_v56  ;;  %v1453_v62 = vsel %vm1404_vm0, %v3605_v49, 0.0  ;;  %v1558_v63 = vmul.f32 %v3605_v49, %v3605_v49 }
 0x157   : > { %v1454_v0 = vadd.f32 %v1453_v62, %v3603_v43  ;;  %v1559_v10 = vmul.f32 %v3607_v53, %v3607_v53 }
 0x158   : > { %v1645_v1 = vsel %vm1404_vm0, %v1558_v63, 0.0  ;;  %v1457_v3 = vsel %vm1404_vm0, %v3611_v61, 0.0  ;;  %v1560_v4 = vmul.f32 %v3611_v61, %v3611_v61 }
 0x159   : > { %1643 = vadd.xlane.f32.xlu1 %v1642_v58  ;;  %1455 = vadd.xlane.f32.xlu0 %v1454_v0  ;;  %v1646_v6 = vadd.f32 %v1645_v1, %v1557_v60  ;;  %v1458_v9 = vadd.f32 %v1457_v3, %v3607_v53  ;;  %v1122_v14 = vpop.f32.mrb[28].mxu1 }
 0x15a   : > { %v1315_v15 = vpop.f32.mrb[28].mxu0  ;;  %v1649_v18 = vsel %vm1404_vm0, %v1560_v4, 0.0  ;;  %v1124_v22 = vpop.f32.mrb[29].mxu1 }
 0x15b   : > { %v3627_v20 = vadd.f32 %v1315_v15, %v1122_v14  ;;  %v1317_v23 = vpop.f32.mrb[29].mxu0  ;;  %v1126_v28 = vpop.f32.mrb[30].mxu1  ;;  %v1650_v34 = vadd.f32 %v1649_v18, %v1559_v10 }
 0x15c   : > { %v3629_v27 = vadd.f32 %v1317_v23, %v1124_v22  ;;  %v1319_v29 = vpop.f32.mrb[30].mxu0  ;;  %v1128_v32 = vpop.f32.mrb[31].mxu1 }
 0x15d   : > { %4270 = vst [vmem:[#allocation2_spill] sm:$0xff] %v3627_v20  ;;  %1647 = vadd.xlane.f32.xlu0 %v1646_v6  ;;  %1459 = vadd.xlane.f32.xlu1 %v1458_v9  ;;  %v3631_v31 = vadd.f32 %v1319_v29, %v1126_v28  ;;  %v1321_v33 = vpop.f32.mrb[31].mxu0  ;;  %v1561_v36 = vmul.f32 %v3627_v20, %v3627_v20 }
 0x15e   : > { %4271 = vst [vmem:[#allocation3_spill] sm:$0xff] %v3629_v27  ;;  %v3635_v37 = vadd.f32 %v1321_v33, %v1128_v32  ;;  %v1461_v38 = vsel %vm1404_vm0, %v3629_v27, 0.0  ;;  %v1562_v39 = vmul.f32 %v3629_v27, %v3629_v27 }
 0x15f   : > { %v1462_v40 = vadd.f32 %v1461_v38, %v3627_v20  ;;  %v1563_v56 = vmul.f32 %v3631_v31, %v3631_v31 }
 0x160   : > { %v1653_v42 = vsel %vm1404_vm0, %v1562_v39, 0.0  ;;  %v1465_v45 = vsel %vm1404_vm0, %v3635_v37, 0.0  ;;  %v1564_v47 = vmul.f32 %v3635_v37, %v3635_v37 }
 0x161   : > { %1651 = vadd.xlane.f32.xlu1 %v1650_v34  ;;  %1463 = vadd.xlane.f32.xlu0 %v1462_v40  ;;  %v1654_v50 = vadd.f32 %v1653_v42, %v1561_v36  ;;  %v1466_v52 = vadd.f32 %v1465_v45, %v3631_v31  ;;  %v1132_v57 = vpop.f32.mrb[32].mxu1 }
 0x162   : > { %v1325_v58 = vpop.f32.mrb[32].mxu0  ;;  %v1657_v60 = vsel %vm1404_vm0, %v1564_v47, 0.0  ;;  %v1134_v63 = vpop.f32.mrb[33].mxu1 }
 0x163   : > { %v3651_v62 = vadd.f32 %v1325_v58, %v1132_v57  ;;  %v1327_v0 = vpop.f32.mrb[33].mxu0  ;;  %v1136_v3 = vpop.f32.mrb[34].mxu1  ;;  %v1658_v14 = vadd.f32 %v1657_v60, %v1563_v56 }
 0x164   : > { %v3653_v1 = vadd.f32 %v1327_v0, %v1134_v63  ;;  %v1329_v4 = vpop.f32.mrb[34].mxu0  ;;  %v1138_v9 = vpop.f32.mrb[35].mxu1 }
 0x165   : > { %4272 = vst [vmem:[#allocation4_spill] sm:$0xff] %v3651_v62  ;;  %1655 = vadd.xlane.f32.xlu0 %v1654_v50  ;;  %1467 = vadd.xlane.f32.xlu1 %v1466_v52  ;;  %v3655_v6 = vadd.f32 %v1329_v4, %v1136_v3  ;;  %v1331_v10 = vpop.f32.mrb[35].mxu0  ;;  %v1565_v15 = vmul.f32 %v3651_v62, %v3651_v62 }
 0x166   : > { %4273 = vst [vmem:[#allocation5_spill] sm:$0xff] %v3653_v1  ;;  %v3659_v18 = vadd.f32 %v1331_v10, %v1138_v9  ;;  %v1469_v22 = vsel %vm1404_vm0, %v3653_v1, 0.0  ;;  %v1566_v23 = vmul.f32 %v3653_v1, %v3653_v1 }
 0x167   : > { %v1470_v28 = vadd.f32 %v1469_v22, %v3651_v62  ;;  %v1567_v38 = vmul.f32 %v3655_v6, %v3655_v6 }
 0x168   : > { %v1661_v29 = vsel %vm1404_vm0, %v1566_v23, 0.0  ;;  %v1473_v32 = vsel %vm1404_vm0, %v3659_v18, 0.0  ;;  %v1568_v33 = vmul.f32 %v3659_v18, %v3659_v18 }
 0x169   : > { %1659 = vadd.xlane.f32.xlu1 %v1658_v14  ;;  %1471 = vadd.xlane.f32.xlu0 %v1470_v28  ;;  %v1662_v34 = vadd.f32 %v1661_v29, %v1565_v15  ;;  %v1474_v36 = vadd.f32 %v1473_v32, %v3655_v6  ;;  %v1142_v39 = vpop.f32.mrb[36].mxu1 }
 0x16a   : > { %v1335_v40 = vpop.f32.mrb[36].mxu0  ;;  %v1665_v42 = vsel %vm1404_vm0, %v1568_v33, 0.0  ;;  %v1144_v47 = vpop.f32.mrb[37].mxu1 }
 0x16b   : > { %v3675_v45 = vadd.f32 %v1335_v40, %v1142_v39  ;;  %v1337_v50 = vpop.f32.mrb[37].mxu0  ;;  %v1146_v56 = vpop.f32.mrb[38].mxu1  ;;  %v1666_v0 = vadd.f32 %v1665_v42, %v1567_v38 }
 0x16c   : > { %v3677_v52 = vadd.f32 %v1337_v50, %v1144_v47  ;;  %v1339_v57 = vpop.f32.mrb[38].mxu0  ;;  %v1148_v60 = vpop.f32.mrb[39].mxu1 }
 0x16d   : > { %4274 = vst [vmem:[#allocation6_spill] sm:$0xff] %v3675_v45  ;;  %1663 = vadd.xlane.f32.xlu0 %v1662_v34  ;;  %1475 = vadd.xlane.f32.xlu1 %v1474_v36  ;;  %v3679_v58 = vadd.f32 %v1339_v57, %v1146_v56  ;;  %v1341_v63 = vpop.f32.mrb[39].mxu0  ;;  %v1569_v3 = vmul.f32 %v3675_v45, %v3675_v45 }
 0x16e   : > { %4275 = vst [vmem:[#allocation7_spill] sm:$0xff] %v3677_v52  ;;  %v3683_v4 = vadd.f32 %v1341_v63, %v1148_v60  ;;  %v1477_v9 = vsel %vm1404_vm0, %v3677_v52, 0.0  ;;  %v1570_v10 = vmul.f32 %v3677_v52, %v3677_v52 }
 0x16f   : > { %4276 = vst [vmem:[#allocation8_spill] sm:$0xff] %v3679_v58  ;;  %v1478_v14 = vadd.f32 %v1477_v9, %v3675_v45  ;;  %v1571_v32 = vmul.f32 %v3679_v58, %v3679_v58 }
 0x170   : > { %4277 = vst [vmem:[#allocation9_spill] sm:$0xff] %v3683_v4  ;;  %v1669_v15 = vsel %vm1404_vm0, %v1570_v10, 0.0  ;;  %v1481_v22 = vsel %vm1404_vm0, %v3683_v4, 0.0  ;;  %v1572_v23 = vmul.f32 %v3683_v4, %v3683_v4 }
 0x171   : > { %1667 = vadd.xlane.f32.xlu1 %v1666_v0  ;;  %1479 = vadd.xlane.f32.xlu0 %v1478_v14  ;;  %v1670_v28 = vadd.f32 %v1669_v15, %v1569_v3  ;;  %v1482_v29 = vadd.f32 %v1481_v22, %v3679_v58  ;;  %v1152_v33 = vpop.f32.mrb[40].mxu1 }
 0x172   : > { %v1345_v34 = vpop.f32.mrb[40].mxu0  ;;  %v1673_v36 = vsel %vm1404_vm0, %v1572_v23, 0.0  ;;  %v1154_v39 = vpop.f32.mrb[41].mxu1 }
 0x173   : > { %v3699_v38 = vadd.f32 %v1345_v34, %v1152_v33  ;;  %v1347_v40 = vpop.f32.mrb[41].mxu0  ;;  %v1156_v47 = vpop.f32.mrb[42].mxu1  ;;  %v1674_v63 = vadd.f32 %v1673_v36, %v1571_v32 }
 0x174   : > { %v3701_v42 = vadd.f32 %v1347_v40, %v1154_v39  ;;  %v1349_v50 = vpop.f32.mrb[42].mxu0  ;;  %v1158_v57 = vpop.f32.mrb[43].mxu1 }
 0x175   : > { %4278 = vst [vmem:[#allocation10_spill] sm:$0xff] %v3699_v38  ;;  %1671 = vadd.xlane.f32.xlu0 %v1670_v28  ;;  %1483 = vadd.xlane.f32.xlu1 %v1482_v29  ;;  %v3703_v56 = vadd.f32 %v1349_v50, %v1156_v47  ;;  %v1351_v60 = vpop.f32.mrb[43].mxu0  ;;  %v1573_v0 = vmul.f32 %v3699_v38, %v3699_v38 }
 0x176   : > { %4279 = vst [vmem:[#allocation11_spill] sm:$0xff] %v3701_v42  ;;  %v3707_v3 = vadd.f32 %v1351_v60, %v1158_v57  ;;  %v1485_v9 = vsel %vm1404_vm0, %v3701_v42, 0.0  ;;  %v1574_v10 = vmul.f32 %v3701_v42, %v3701_v42 }
 0x177   : > { %4280 = vst [vmem:[#allocation12_spill] sm:$0xff] %v3703_v56  ;;  %v1486_v14 = vadd.f32 %v1485_v9, %v3699_v38  ;;  %v1575_v32 = vmul.f32 %v3703_v56, %v3703_v56 }
 0x178   : > { %4281 = vst [vmem:[#allocation13_spill] sm:$0xff] %v3707_v3  ;;  %v1677_v15 = vsel %vm1404_vm0, %v1574_v10, 0.0  ;;  %v1489_v22 = vsel %vm1404_vm0, %v3707_v3, 0.0  ;;  %v1576_v23 = vmul.f32 %v3707_v3, %v3707_v3 }
 0x179   : > { %1675 = vadd.xlane.f32.xlu1 %v1674_v63  ;;  %1487 = vadd.xlane.f32.xlu0 %v1486_v14  ;;  %v1678_v28 = vadd.f32 %v1677_v15, %v1573_v0  ;;  %v1490_v29 = vadd.f32 %v1489_v22, %v3703_v56  ;;  %v1162_v33 = vpop.f32.mrb[44].mxu1 }
 0x17a   : > { %v1355_v34 = vpop.f32.mrb[44].mxu0  ;;  %v1681_v36 = vsel %vm1404_vm0, %v1576_v23, 0.0  ;;  %v1164_v40 = vpop.f32.mrb[45].mxu1 }
 0x17b   : > { %v3723_v39 = vadd.f32 %v1355_v34, %v1162_v33  ;;  %v1357_v47 = vpop.f32.mrb[45].mxu0  ;;  %v1166_v57 = vpop.f32.mrb[46].mxu1  ;;  %v1682_v10 = vadd.f32 %v1681_v36, %v1575_v32 }
 0x17c   : > { %v3725_v50 = vadd.f32 %v1357_v47, %v1164_v40  ;;  %v1359_v60 = vpop.f32.mrb[46].mxu0  ;;  %v1168_v0 = vpop.f32.mrb[47].mxu1 }
 0x17d   : > { %4282 = vst [vmem:[#allocation14_spill] sm:$0xff] %v3723_v39  ;;  %1679 = vadd.xlane.f32.xlu0 %v1678_v28  ;;  %1491 = vadd.xlane.f32.xlu1 %v1490_v29  ;;  %v3727_v63 = vadd.f32 %v1359_v60, %v1166_v57  ;;  %v1361_v9 = vpop.f32.mrb[47].mxu0  ;;  %v1577_v14 = vmul.f32 %v3723_v39, %v3723_v39 }
 0x17e   : > { %4283 = vst [vmem:[#allocation15_spill] sm:$0xff] %v3725_v50  ;;  %v3731_v15 = vadd.f32 %v1361_v9, %v1168_v0  ;;  %v1493_v22 = vsel %vm1404_vm0, %v3725_v50, 0.0  ;;  %v1578_v23 = vmul.f32 %v3725_v50, %v3725_v50 }
 0x17f   : > { %4284 = vst [vmem:[#allocation16_spill] sm:$0xff] %v3727_v63  ;;  %v1494_v33 = vadd.f32 %v1493_v22, %v3723_v39  ;;  %v1579_v40 = vmul.f32 %v3727_v63, %v3727_v63 }
 0x180   : > { %4285 = vst [vmem:[#allocation17_spill] sm:$0xff] %v3731_v15  ;;  %v1685_v28 = vsel %vm1404_vm0, %v1578_v23, 0.0  ;;  %v1497_v29 = vsel %vm1404_vm0, %v3731_v15, 0.0  ;;  %v1580_v32 = vmul.f32 %v3731_v15, %v3731_v15 }
 0x181   : > { %1683 = vadd.xlane.f32.xlu1 %v1682_v10  ;;  %1495 = vadd.xlane.f32.xlu0 %v1494_v33  ;;  %v1686_v34 = vadd.f32 %v1685_v28, %v1577_v14  ;;  %v1498_v36 = vadd.f32 %v1497_v29, %v3727_v63  ;;  %v1172_v47 = vpop.f32.mrb[48].mxu1  ;;  %v1982_v63 = vld [vmem:[%s3870_s16 + $0x8] sm:$0xff] }
 0x182   : > { %v1365_v57 = vpop.f32.mrb[48].mxu0  ;;  %v1689_v60 = vsel %vm1404_vm0, %v1580_v32, 0.0  ;;  %v1174_v9 = vpop.f32.mrb[49].mxu1 }
 0x183   : > { %v3747_v0 = vadd.f32 %v1365_v57, %v1172_v47  ;;  %v1367_v22 = vpop.f32.mrb[49].mxu0  ;;  %v1176_v50 = vpop.f32.mrb[50].mxu1  ;;  %v1690_v28 = vadd.f32 %v1689_v60, %v1579_v40 }
 0x184   : > { %v3749_v23 = vadd.f32 %v1367_v22, %v1174_v9  ;;  %v1369_v39 = vpop.f32.mrb[50].mxu0  ;;  %v1178_v14 = vpop.f32.mrb[51].mxu1 }
 0x185   : > { %4286 = vst [vmem:[#allocation18_spill] sm:$0xff] %v3747_v0  ;;  %1687 = vadd.xlane.f32.xlu0 %v1686_v34  ;;  %1499 = vadd.xlane.f32.xlu1 %v1498_v36  ;;  %v3751_v10 = vadd.f32 %v1369_v39, %v1176_v50  ;;  %v1371_v33 = vpop.f32.mrb[51].mxu0  ;;  %v1581_v29 = vmul.f32 %v3747_v0, %v3747_v0 }
 0x186   : > { %4287 = vst [vmem:[#allocation19_spill] sm:$0xff] %v3749_v23  ;;  %v3755_v42 = vadd.f32 %v1371_v33, %v1178_v14  ;;  %v1501_v32 = vsel %vm1404_vm0, %v3749_v23, 0.0  ;;  %v1582_v47 = vmul.f32 %v3749_v23, %v3749_v23 }
 0x187   : > { %4288 = vst [vmem:[#allocation20_spill] sm:$0xff] %v3751_v10  ;;  %v1502_v57 = vadd.f32 %v1501_v32, %v3747_v0  ;;  %v1583_v60 = vmul.f32 %v3751_v10, %v3751_v10 }
 0x188   : > { %4289 = vst [vmem:[#allocation21_spill] sm:$0xff] %v3755_v42  ;;  %v1693_v34 = vsel %vm1404_vm0, %v1582_v47, 0.0  ;;  %v1505_v39 = vsel %vm1404_vm0, %v3755_v42, 0.0  ;;  %v1584_v50 = vmul.f32 %v3755_v42, %v3755_v42 }
 0x189   : > { %1691 = vadd.xlane.f32.xlu1 %v1690_v28  ;;  %1503 = vadd.xlane.f32.xlu0 %v1502_v57  ;;  %v1694_v36 = vadd.f32 %v1693_v34, %v1581_v29  ;;  %v1506_v40 = vadd.f32 %v1505_v39, %v3751_v10  ;;  %v1182_v9 = vpop.f32.mrb[52].mxu1 }
 0x18a   : > { %v1375_v22 = vpop.f32.mrb[52].mxu0  ;;  %v1697_v14 = vsel %vm1404_vm0, %v1584_v50, 0.0  ;;  %v1184_v32 = vpop.f32.mrb[53].mxu1 }
 0x18b   : > { %v3771_v33 = vadd.f32 %v1375_v22, %v1182_v9  ;;  %v1377_v47 = vpop.f32.mrb[53].mxu0  ;;  %v1186_v0 = vpop.f32.mrb[54].mxu1  ;;  %v1698_v34 = vadd.f32 %v1697_v14, %v1583_v60 }
 0x18c   : > { %v3773_v23 = vadd.f32 %v1377_v47, %v1184_v32  ;;  %v1379_v42 = vpop.f32.mrb[54].mxu0  ;;  %v1188_v29 = vpop.f32.mrb[55].mxu1 }
 0x18d   : > { %4290 = vst [vmem:[#allocation22_spill] sm:$0xff] %v3771_v33  ;;  %1695 = vadd.xlane.f32.xlu0 %v1694_v36  ;;  %1507 = vadd.xlane.f32.xlu1 %v1506_v40  ;;  %v3775_v28 = vadd.f32 %v1379_v42, %v1186_v0  ;;  %v1381_v57 = vpop.f32.mrb[55].mxu0  ;;  %v1585_v39 = vmul.f32 %v3771_v33, %v3771_v33 }
 0x18e   : > { %4291 = vst [vmem:[#allocation23_spill] sm:$0xff] %v3773_v23  ;;  %v3779_v10 = vadd.f32 %v1381_v57, %v1188_v29  ;;  %v1509_v50 = vsel %vm1404_vm0, %v3773_v23, 0.0  ;;  %v1586_v9 = vmul.f32 %v3773_v23, %v3773_v23 }
 0x18f   : > { %4292 = vst [vmem:[#allocation24_spill] sm:$0xff] %v3775_v28  ;;  %v1510_v22 = vadd.f32 %v1509_v50, %v3771_v33  ;;  %v1587_v14 = vmul.f32 %v3775_v28, %v3775_v28 }
 0x190   : > { %4293 = vst [vmem:[#allocation25_spill] sm:$0xff] %v3779_v10  ;;  %v1701_v36 = vsel %vm1404_vm0, %v1586_v9, 0.0  ;;  %v1513_v42 = vsel %vm1404_vm0, %v3779_v10, 0.0  ;;  %v1588_v0 = vmul.f32 %v3779_v10, %v3779_v10 }
 0x191   : > { %1699 = vadd.xlane.f32.xlu1 %v1698_v34  ;;  %1511 = vadd.xlane.f32.xlu0 %v1510_v22  ;;  %v1702_v40 = vadd.f32 %v1701_v36, %v1585_v39  ;;  %v1514_v60 = vadd.f32 %v1513_v42, %v3775_v28  ;;  %v1192_v32 = vpop.f32.mrb[56].mxu1 }
 0x192   : > { %v1385_v47 = vpop.f32.mrb[56].mxu0  ;;  %v1705_v29 = vsel %vm1404_vm0, %v1588_v0, 0.0  ;;  %v1194_v50 = vpop.f32.mrb[57].mxu1 }
 0x193   : > { %v3795_v57 = vadd.f32 %v1385_v47, %v1192_v32  ;;  %v1387_v9 = vpop.f32.mrb[57].mxu0  ;;  %v1196_v33 = vpop.f32.mrb[58].mxu1  ;;  %v1706_v36 = vadd.f32 %v1705_v29, %v1587_v14 }
 0x194   : > { %v3797_v23 = vadd.f32 %v1387_v9, %v1194_v50  ;;  %v1389_v10 = vpop.f32.mrb[58].mxu0  ;;  %v1198_v39 = vpop.f32.mrb[59].mxu1 }
 0x195   : > { %4294 = vst [vmem:[#allocation26_spill] sm:$0xff] %v3795_v57  ;;  %1703 = vadd.xlane.f32.xlu0 %v1702_v40  ;;  %1515 = vadd.xlane.f32.xlu1 %v1514_v60  ;;  %v3799_v34 = vadd.f32 %v1389_v10, %v1196_v33  ;;  %v1391_v22 = vpop.f32.mrb[59].mxu0  ;;  %v1589_v42 = vmul.f32 %v3795_v57, %v3795_v57 }
 0x196   : > { %4295 = vst [vmem:[#allocation27_spill] sm:$0xff] %v3797_v23  ;;  %v3803_v28 = vadd.f32 %v1391_v22, %v1198_v39  ;;  %v1517_v0 = vsel %vm1404_vm0, %v3797_v23, 0.0  ;;  %v1590_v32 = vmul.f32 %v3797_v23, %v3797_v23 }
 0x197   : > { %4296 = vst [vmem:[#allocation28_spill] sm:$0xff] %v3799_v34  ;;  %v1518_v47 = vadd.f32 %v1517_v0, %v3795_v57  ;;  %v1591_v29 = vmul.f32 %v3799_v34, %v3799_v34 }
 0x198   : > { %4297 = vst [vmem:[#allocation29_spill] sm:$0xff] %v3803_v28  ;;  %v1709_v40 = vsel %vm1404_vm0, %v1590_v32, 0.0  ;;  %v1521_v10 = vsel %vm1404_vm0, %v3803_v28, 0.0  ;;  %v1592_v33 = vmul.f32 %v3803_v28, %v3803_v28 }
 0x199   : > { %1707 = vadd.xlane.f32.xlu1 %v1706_v36  ;;  %1519 = vadd.xlane.f32.xlu0 %v1518_v47  ;;  %v1710_v60 = vadd.f32 %v1709_v40, %v1589_v42  ;;  %v1522_v14 = vadd.f32 %v1521_v10, %v3799_v34  ;;  %v1202_v50 = vpop.f32.mrb[60].mxu1 }
 0x19a   : > { %v1395_v9 = vpop.f32.mrb[60].mxu0  ;;  %v1713_v39 = vsel %vm1404_vm0, %v1592_v33, 0.0  ;;  %v1204_v0 = vpop.f32.mrb[61].mxu1 }
 0x19b   : > { %v3819_v22 = vadd.f32 %v1395_v9, %v1202_v50  ;;  %v1397_v32 = vpop.f32.mrb[61].mxu0  ;;  %v1206_v57 = vpop.f32.mrb[62].mxu1  ;;  %v1714_v40 = vadd.f32 %v1713_v39, %v1591_v29 }
 0x19c   : > { %v3821_v23 = vadd.f32 %v1397_v32, %v1204_v0  ;;  %v1399_v28 = vpop.f32.mrb[62].mxu0  ;;  %v1208_v42 = vpop.f32.mrb[63].mxu1 }
 0x19d   : > { %4298 = vst [vmem:[#allocation30_spill] sm:$0xff] %v3819_v22  ;;  %1711 = vadd.xlane.f32.xlu0 %v1710_v60  ;;  %1523 = vadd.xlane.f32.xlu1 %v1522_v14  ;;  %v3823_v36 = vadd.f32 %v1399_v28, %v1206_v57  ;;  %v1401_v47 = vpop.f32.mrb[63].mxu0  ;;  %v1593_v10 = vmul.f32 %v3819_v22, %v3819_v22 }
 0x19e   : > { %4299 = vst [vmem:[#allocation31_spill] sm:$0xff] %v3821_v23  ;;  %v3827_v34 = vadd.f32 %v1401_v47, %v1208_v42  ;;  %v1525_v33 = vsel %vm1404_vm0, %v3821_v23, 0.0  ;;  %v1594_v50 = vmul.f32 %v3821_v23, %v3821_v23 }
 0x19f   : > { %4300 = vst [vmem:[#allocation32_spill] sm:$0xff] %v3823_v36  ;;  %v1526_v9 = vadd.f32 %v1525_v33, %v3819_v22  ;;  %v1595_v39 = vmul.f32 %v3823_v36, %v3823_v36 }
 0x1a0   : > { %4301 = vst [vmem:[#allocation33_spill] sm:$0xff] %v3827_v34  ;;  %v1717_v60 = vsel %vm1404_vm0, %v1594_v50, 0.0  ;;  %v1529_v28 = vsel %vm1404_vm0, %v3827_v34, 0.0  ;;  %v1596_v57 = vmul.f32 %v3827_v34, %v3827_v34 }
 0x1a1   : > { %1715 = vadd.xlane.f32.xlu1 %v1714_v40  ;;  %1527 = vadd.xlane.f32.xlu0 %v1526_v9  ;;  %v1718_v14 = vadd.f32 %v1717_v60, %v1593_v10  ;;  %v1530_v29 = vadd.f32 %v1529_v28, %v3823_v36 }
 0x1a2   : > { %v1721_v0 = vsel %vm1404_vm0, %v1596_v57, 0.0 }
 0x1a3   : > { %v1722_v32 = vadd.f32 %v1721_v0, %v1595_v39 }
 0x1a5   : > { %1719 = vadd.xlane.f32.xlu0 %v1718_v14  ;;  %1531 = vadd.xlane.f32.xlu1 %v1530_v29 }
 0x1a9   : > { %1723 = vadd.xlane.f32.xlu1 %v1722_v32 }
 0x1b6   : > { %v1408_v42 = vpop.xlane.xlu0 %1407 }
 0x1b7   : > { %v1725_v50 = vmul.f32 0.0051020407, %v1408_v42 }
 0x1b9   : > { %v1789_v60 = vmul.f32 %v1725_v50, %v1725_v50 }
 0x1ba   : > { %v1604_v47 = vpop.xlane.xlu1 %1603  ;;  %v1412_v33 = vpop.xlane.xlu0 %1411 }
 0x1bb   : > { %v1726_v23 = vmul.f32 0.0051020407, %v1412_v33  ;;  %v1758_v22 = vmul.f32 0.0051020407, %v1604_v47 }
 0x1bd   : > { %v1790_v40 = vmul.f32 %v1726_v23, %v1726_v23 }
 0x1be   : > { %v1600_v10 = vpop.xlane.xlu0 %1599  ;;  %v1416_v9 = vpop.xlane.xlu1 %1415 }
 0x1bf   : > { %v1822_v28 = vsub.f32 %v1758_v22, %v1790_v40  ;;  %v1757_v34 = vmul.f32 0.0051020407, %v1600_v10  ;;  %v3843_v36 = vmul.f32 0.0051020407, %v1416_v9 }
 0x1c1   : > { %v1854_v57 = vadd.f32 1e-05, %v1822_v28  ;;  %v1821_v14 = vsub.f32 %v1757_v34, %v1789_v60  ;;  %v1791_v29 = vmul.f32 %v3843_v36, %v3843_v36  ;;  %v1918_v28 = vld [vmem:[%s3853_s9 + $0x8] sm:$0xff] }
 0x1c2   : > { %v1608_v39 = vpop.xlane.xlu0 %1607  ;;  %v1420_v0 = vpop.xlane.xlu1 %1419 }
 0x1c3   : > { %3085 = vrsqrt.f32 %v1854_v57  ;;  %v1853_v32 = vadd.f32 1e-05, %v1821_v14  ;;  %v1759_v42 = vmul.f32 0.0051020407, %v1608_v39  ;;  %v3847_v47 = vmul.f32 0.0051020407, %v1420_v0 }
 0x1c5   : > { %3087 = vrsqrt.f32 %v1853_v32  ;;  %v1823_v33 = vsub.f32 %v1759_v42, %v1791_v29  ;;  %v1792_v40 = vmul.f32 %v3847_v47, %v3847_v47 }
 0x1c6   : > { %v1612_v38 = vpop.xlane.xlu1 %1611  ;;  %v1424_v22 = vpop.xlane.xlu0 %1423 }
 0x1c7   : > { %v1855_v34 = vadd.f32 1e-05, %v1823_v33  ;;  %v1760_v10 = vmul.f32 0.0051020407, %v1612_v38  ;;  %v3857_v9 = vmul.f32 0.0051020407, %v1424_v22 }
 0x1c8   : > { %v1917_v38 = vld [vmem:[%s3853_s9] sm:$0xff] }
 0x1c9   : > { %v1824_v60 = vsub.f32 %v1760_v10, %v1792_v40  ;;  %3089 = vrsqrt.f32 %v1855_v34  ;;  %v1793_v39 = vmul.f32 %v3857_v9, %v3857_v9 }
 0x1ca   : > { %v1616_v57 = vpop.xlane.xlu0 %1615  ;;  %v1428_v14 = vpop.xlane.xlu1 %1427 }
 0x1cb   : > { %v1856_v29 = vadd.f32 1e-05, %v1824_v60  ;;  %v1761_v0 = vmul.f32 0.0051020407, %v1616_v57  ;;  %v3862_v32 = vmul.f32 0.0051020407, %v1428_v14 }
 0x1cd   : > { %v3086_v42 = vpop.eup %3085  ;;  %3091 = vrsqrt.f32 %v1856_v29  ;;  %v1794_v33 = vmul.f32 %v3862_v32, %v3862_v32  ;;  %v1825_v10 = vsub.f32 %v1761_v0, %v1793_v39 }
 0x1ce   : > { %v1950_v22 = vmul.f32 %v3086_v42, %v1918_v28  ;;  %v1620_v15 = vpop.xlane.xlu1 %1619  ;;  %v1432_v40 = vpop.xlane.xlu0 %1431  ;;  %v1981_v28 = vld [vmem:[%s3870_s16] sm:$0xff] }
 0x1cf   : > { %v3088_v34 = vpop.eup %3087  ;;  %v1762_v60 = vmul.f32 0.0051020407, %v1620_v15  ;;  %v3874_v42 = vmul.f32 0.0051020407, %v1432_v40  ;;  %v1857_v56 = vadd.f32 1e-05, %v1825_v10 }
 0x1d0   : > { %v2014_v57 = vmul.f32 %v1950_v22, %v1726_v23  ;;  %2084 = vperm.xlu1 %2892, %v1950_v22   ;;  %v1949_v14 = vmul.f32 %v3088_v34, %v1917_v38  ;;  %v1920_v38 = vld [vmem:[%s3853_s9 + $0x18] sm:$0xff] }
 0x1d1   : > { %v1826_v29 = vsub.f32 %v1762_v60, %v1794_v33  ;;  %v1919_v33 = vld [vmem:[%s3853_s9 + $0x10] sm:$0xff]  ;;  %v1795_v22 = vmul.f32 %v3874_v42, %v3874_v42  ;;  %v1984_v60 = vld [vmem:[%s3870_s16 + $0x18] sm:$0xff] }
 0x1d2   : > { %v1624_v52 = vpop.xlane.xlu0 %1623  ;;  %v1436_v45 = vpop.xlane.xlu1 %1435  ;;  %2079 = vperm.xlu0 %2891, %v1949_v14   ;;  %v2013_v3 = vmul.f32 %v1949_v14, %v1725_v50  ;;  %v2046_v15 = vsub.f32 %v1982_v63, %v2014_v57 }
 0x1d3   : > { %v1858_v1 = vadd.f32 1e-05, %v1826_v29  ;;  %v3876_v62 = vmul.f32 0.0051020407, %v1436_v45  ;;  %v3090_v39 = vpop.eup %3089  ;;  %v1763_v40 = vmul.f32 0.0051020407, %v1624_v52 }
 0x1d4   : > { %v2045_v23 = vsub.f32 %v1981_v28, %v2013_v3  ;;  %v1951_v63 = vmul.f32 %v3090_v39, %v1919_v33  ;;  %v1922_v33 = vld [vmem:[%s3853_s9 + $0x28] sm:$0xff] }
 0x1d5   : > { %3093 = vrsqrt.f32 %v1858_v1  ;;  %v1796_v0 = vmul.f32 %v3876_v62, %v3876_v62  ;;  %v1827_v57 = vsub.f32 %v1763_v40, %v1795_v22 }
 0x1d6   : > { %v1628_v34 = vpop.xlane.xlu1 %1627  ;;  %v1440_v50 = vpop.xlane.xlu0 %1439  ;;  %2308 = vperm.xlu0 %2891, %v2046_v15   ;;  %2303 = vperm.xlu1 %2892, %v2045_v23   ;;  %3095 = vrsqrt.f32 %v1857_v56  ;;  %v2015_v56 = vmul.f32 %v1951_v63, %v3843_v36 }
 0x1d7   : > { %v3092_v45 = vpop.eup %3091  ;;  %v1764_v10 = vmul.f32 0.0051020407, %v1628_v34  ;;  %v3886_v4 = vmul.f32 0.0051020407, %v1440_v50 }
 0x1d8   : > { %v1952_v1 = vmul.f32 %v3092_v45, %v1920_v38  ;;  %v1859_v38 = vadd.f32 1e-05, %v1827_v57 }
 0x1d9   : > { %v1828_v3 = vsub.f32 %v1764_v10, %v1796_v0  ;;  %v1983_v0 = vld [vmem:[%s3870_s16 + $0x10] sm:$0xff]  ;;  %v1797_v34 = vmul.f32 %v3886_v4, %v3886_v4 }
 0x1da   : > { %v1632_v14 = vpop.xlane.xlu0 %1631  ;;  %v1444_v29 = vpop.xlane.xlu1 %1443  ;;  %2089 = vperm.xlu1 %2892, %v1951_v63   ;;  %v2016_v28 = vmul.f32 %v1952_v1, %v3847_v47  ;;  %v2047_v36 = vsub.f32 %v1983_v0, %v2015_v56  ;;  %v1924_v0 = vld [vmem:[%s3853_s9 + $0x38] sm:$0xff] }
 0x1db   : > { %v1860_v52 = vadd.f32 1e-05, %v1828_v3  ;;  %v3888_v15 = vmul.f32 0.0051020407, %v1444_v29  ;;  %v1765_v50 = vmul.f32 0.0051020407, %v1632_v14 }
 0x1dc   : > { %v2048_v23 = vsub.f32 %v1984_v60, %v2016_v28  ;;  %v1986_v60 = vld [vmem:[%s3870_s16 + $0x28] sm:$0xff]  ;;  %v1921_v29 = vld [vmem:[%s3853_s9 + $0x20] sm:$0xff] }
 0x1dd   : > { %3097 = vrsqrt.f32 %v1860_v52  ;;  %v1798_v39 = vmul.f32 %v3888_v15, %v3888_v15 }
 0x1de   : > { %v1636_v22 = vpop.xlane.xlu1 %1635  ;;  %v1448_v40 = vpop.xlane.xlu0 %1447  ;;  %2318 = vperm.xlu0 %2891, %v2048_v23   ;;  %2094 = vperm.xlu1 %2892, %v1952_v1   ;;  %3099 = vrsqrt.f32 %v1859_v38  ;;  %v1829_v1 = vsub.f32 %v1765_v50, %v1797_v34 }
 0x1df   : > { %v3094_v47 = vpop.eup %3093  ;;  %v1766_v45 = vmul.f32 0.0051020407, %v1636_v22  ;;  %v3900_v58 = vmul.f32 0.0051020407, %v1448_v40 }
 0x1e0   : > { %v1954_v10 = vmul.f32 %v3094_v47, %v1922_v33  ;;  %v3096_v63 = vpop.eup %3095  ;;  %v1861_v22 = vadd.f32 1e-05, %v1829_v1 }
 0x1e1   : > { %v1830_v3 = vsub.f32 %v1766_v45, %v1798_v39  ;;  %v1953_v56 = vmul.f32 %v3096_v63, %v1921_v29  ;;  %v1799_v40 = vmul.f32 %v3900_v58, %v3900_v58  ;;  %v1988_v63 = vld [vmem:[%s3870_s16 + $0x38] sm:$0xff] }
 0x1e2   : > { %v1640_v28 = vpop.xlane.xlu0 %1639  ;;  %v1452_v57 = vpop.xlane.xlu1 %1451  ;;  %2313 = vperm.xlu1 %2892, %v2047_v36   ;;  %v2018_v52 = vmul.f32 %v1954_v10, %v3862_v32 }
 0x1e3   : > { %v1862_v23 = vadd.f32 1e-05, %v1830_v3  ;;  %v3902_v27 = vmul.f32 0.0051020407, %v1452_v57  ;;  %v1767_v47 = vmul.f32 0.0051020407, %v1640_v28  ;;  %v2017_v45 = vmul.f32 %v1953_v56, %v3857_v9 }
 0x1e4   : > { %v2050_v14 = vsub.f32 %v1986_v60, %v2018_v52  ;;  %v1985_v3 = vld [vmem:[%s3870_s16 + $0x20] sm:$0xff] }
 0x1e5   : > { %3101 = vrsqrt.f32 %v1862_v23  ;;  %v1800_v39 = vmul.f32 %v3902_v27, %v3902_v27  ;;  %v1831_v1 = vsub.f32 %v1767_v47, %v1799_v40  ;;  %v2049_v9 = vsub.f32 %v1985_v3, %v2017_v45 }
 0x1e6   : > { %v1644_v33 = vpop.xlane.xlu1 %1643  ;;  %v1456_v38 = vpop.xlane.xlu0 %1455  ;;  %2328 = vperm.xlu0 %2891, %v2050_v14   ;;  %2099 = vperm.xlu1 %2892, %v1953_v56   ;;  %3103 = vrsqrt.f32 %v1861_v22 }
 0x1e7   : > { %v3098_v32 = vpop.eup %3097  ;;  %v1768_v34 = vmul.f32 0.0051020407, %v1644_v33  ;;  %v3912_v60 = vmul.f32 0.0051020407, %v1456_v38  ;;  %v1923_v33 = vld [vmem:[%s3853_s9 + $0x30] sm:$0xff] }
 0x1e8   : > { %v1956_v50 = vmul.f32 %v3098_v32, %v1924_v0  ;;  %v3100_v14 = vpop.eup %3099  ;;  %v1863_v40 = vadd.f32 1e-05, %v1831_v1 }
 0x1e9   : > { %v1832_v36 = vsub.f32 %v1768_v34, %v1800_v39  ;;  %v1926_v39 = vld [vmem:[%s3853_s9 + $0x48] sm:$0xff]  ;;  %v1955_v45 = vmul.f32 %v3100_v14, %v1923_v33  ;;  %v1928_v33 = vld [vmem:[%s3853_s9 + $0x58] sm:$0xff] }
 0x1ea   : > { %v1648_v29 = vpop.xlane.xlu0 %1647  ;;  %v1460_v57 = vpop.xlane.xlu1 %1459  ;;  %2104 = vperm.xlu1 %2892, %v1954_v10   ;;  %v2020_v52 = vmul.f32 %v1956_v50, %v3876_v62  ;;  %v1801_v10 = vmul.f32 %v3912_v60, %v3912_v60 }
 0x1eb   : > { %v1864_v23 = vadd.f32 1e-05, %v1832_v36  ;;  %v3915_v28 = vmul.f32 0.0051020407, %v1460_v57  ;;  %v1769_v38 = vmul.f32 0.0051020407, %v1648_v29  ;;  %v2019_v14 = vmul.f32 %v1955_v45, %v3874_v42 }
 0x1ec   : > { %v2052_v0 = vsub.f32 %v1988_v63, %v2020_v52  ;;  %v1990_v63 = vld [vmem:[%s3870_s16 + $0x48] sm:$0xff] }
 0x1ed   : > { %3105 = vrsqrt.f32 %v1864_v23  ;;  %v1802_v56 = vmul.f32 %v3915_v28, %v3915_v28  ;;  %v1833_v3 = vsub.f32 %v1769_v38, %v1801_v10  ;;  %v1987_v10 = vld [vmem:[%s3870_s16 + $0x30] sm:$0xff]  ;;  %v1925_v38 = vld [vmem:[%s3853_s9 + $0x40] sm:$0xff] }
 0x1ee   : > { %v1652_v62 = vpop.xlane.xlu1 %1651  ;;  %v1464_v32 = vpop.xlane.xlu0 %1463  ;;  %2338 = vperm.xlu0 %2891, %v2052_v0   ;;  %2323 = vperm.xlu1 %2892, %v2049_v9   ;;  %3107 = vrsqrt.f32 %v1863_v40 }
 0x1ef   : > { %v3102_v22 = vpop.eup %3101  ;;  %v1770_v47 = vmul.f32 0.0051020407, %v1652_v62  ;;  %v3925_v0 = vmul.f32 0.0051020407, %v1464_v32  ;;  %v1865_v62 = vadd.f32 1e-05, %v1833_v3 }
 0x1f0   : > { %v1958_v34 = vmul.f32 %v3102_v22, %v1926_v39 }
 0x1f1   : > { %v1834_v36 = vsub.f32 %v1770_v47, %v1802_v56  ;;  %v3104_v56 = vpop.eup %3103  ;;  %v1803_v40 = vmul.f32 %v3925_v0, %v3925_v0 }
 0x1f2   : > { %v1656_v57 = vpop.xlane.xlu0 %1655  ;;  %v1468_v52 = vpop.xlane.xlu1 %1467  ;;  %2124 = vperm.xlu0 %2891, %v1958_v34   ;;  %2109 = vperm.xlu1 %2892, %v1955_v45   ;;  %v2022_v29 = vmul.f32 %v1958_v34, %v3888_v15  ;;  %v2051_v45 = vsub.f32 %v1987_v10, %v2019_v14  ;;  %v1930_v10 = vld [vmem:[%s3853_s9 + $0x68] sm:$0xff] }
 0x1f3   : > { %v1866_v23 = vadd.f32 1e-05, %v1834_v36  ;;  %v3927_v1 = vmul.f32 0.0051020407, %v1468_v52  ;;  %v1771_v47 = vmul.f32 0.0051020407, %v1656_v57  ;;  %v1957_v36 = vmul.f32 %v3104_v56, %v1925_v38 }
 0x1f4   : > { %v2054_v9 = vsub.f32 %v1990_v63, %v2022_v29  ;;  %v1992_v52 = vld [vmem:[%s3870_s16 + $0x58] sm:$0xff]  ;;  %v1989_v38 = vld [vmem:[%s3870_s16 + $0x40] sm:$0xff] }
 0x1f5   : > { %3109 = vrsqrt.f32 %v1866_v23  ;;  %v1804_v39 = vmul.f32 %v3927_v1, %v3927_v1  ;;  %v1835_v23 = vsub.f32 %v1771_v47, %v1803_v40  ;;  %v2021_v56 = vmul.f32 %v1957_v36, %v3886_v4 }
 0x1f6   : > { %v1660_v15 = vpop.xlane.xlu1 %1659  ;;  %v1472_v22 = vpop.xlane.xlu0 %1471  ;;  %2348 = vperm.xlu0 %2891, %v2054_v9   ;;  %2114 = vperm.xlu1 %2892, %v1956_v50   ;;  %3111 = vrsqrt.f32 %v1865_v62  ;;  %v1927_v62 = vld [vmem:[%s3853_s9 + $0x50] sm:$0xff] }
 0x1f7   : > { %v3106_v32 = vpop.eup %3105  ;;  %v1772_v42 = vmul.f32 0.0051020407, %v1660_v15  ;;  %v3939_v20 = vmul.f32 0.0051020407, %v1472_v22 }
 0x1f8   : > { %v1960_v34 = vmul.f32 %v3106_v32, %v1928_v33  ;;  %v1867_v32 = vadd.f32 1e-05, %v1835_v23 }
 0x1f9   : > { %v1836_v63 = vsub.f32 %v1772_v42, %v1804_v39  ;;  %v3108_v39 = vpop.eup %3107  ;;  %v1805_v40 = vmul.f32 %v3939_v20, %v3939_v20 }
 0x1fa   : > { %v1664_v29 = vpop.xlane.xlu0 %1663  ;;  %v1476_v3 = vpop.xlane.xlu1 %1475  ;;  %2134 = vperm.xlu0 %2891, %v1960_v34   ;;  %2333 = vperm.xlu1 %2892, %v2051_v45   ;;  %v2024_v50 = vmul.f32 %v1960_v34, %v3902_v27  ;;  %v2053_v34 = vsub.f32 %v1989_v38, %v2021_v56  ;;  %v1959_v45 = vmul.f32 %v3108_v39, %v1927_v62  ;;  %v1932_v38 = vld [vmem:[%s3853_s9 + $0x78] sm:$0xff]  ;;  %v1991_v62 = vld [vmem:[%s3870_s16 + $0x50] sm:$0xff] }
 0x1fb   : > { %v1868_v9 = vadd.f32 1e-05, %v1836_v63  ;;  %v3941_v57 = vmul.f32 0.0051020407, %v1476_v3  ;;  %v1773_v47 = vmul.f32 0.0051020407, %v1664_v29 }
 0x1fc   : > { %v2056_v14 = vsub.f32 %v1992_v52, %v2024_v50  ;;  %v1994_v52 = vld [vmem:[%s3870_s16 + $0x68] sm:$0xff] }
 0x1fd   : > { %3113 = vrsqrt.f32 %v1868_v9  ;;  %v1806_v33 = vmul.f32 %v3941_v57, %v3941_v57  ;;  %v1837_v23 = vsub.f32 %v1773_v47, %v1805_v40 }
 0x1fe   : > { %v1668_v15 = vpop.xlane.xlu1 %1667  ;;  %v1480_v27 = vpop.xlane.xlu0 %1479  ;;  %2358 = vperm.xlu0 %2891, %v2056_v14   ;;  %2119 = vperm.xlu1 %2892, %v1957_v36   ;;  %3115 = vrsqrt.f32 %v1867_v32 }
 0x1ff   : > { %v3110_v22 = vpop.eup %3109  ;;  %v1774_v4 = vmul.f32 0.0051020407, %v1668_v15  ;;  %v3952_v3 = vmul.f32 0.0051020407, %v1480_v27  ;;  %v1929_v15 = vld [vmem:[%s3853_s9 + $0x60] sm:$0xff] }
 0x200   : > { %v1962_v42 = vmul.f32 %v3110_v22, %v1930_v10  ;;  %v3112_v56 = vpop.eup %3111  ;;  %v1869_v47 = vadd.f32 1e-05, %v1837_v23 }
 0x201   : > { %v1838_v63 = vsub.f32 %v1774_v4, %v1806_v33  ;;  %v2023_v33 = vmul.f32 %v1959_v45, %v3900_v58 }
 0x202   : > { %v1672_v50 = vpop.xlane.xlu0 %1671  ;;  %v1484_v9 = vpop.xlane.xlu1 %1483  ;;  %2144 = vperm.xlu0 %2891, %v1962_v42   ;;  %2343 = vperm.xlu1 %2892, %v2053_v34   ;;  %v2026_v36 = vmul.f32 %v1962_v42, %v3915_v28  ;;  %v1807_v28 = vmul.f32 %v3952_v3, %v3952_v3  ;;  %v1961_v34 = vmul.f32 %v3112_v56, %v1929_v15  ;;  %v1993_v15 = vld [vmem:[%s3870_s16 + $0x60] sm:$0xff] }
 0x203   : > { %v1870_v29 = vadd.f32 1e-05, %v1838_v63  ;;  %v3955_v14 = vmul.f32 0.0051020407, %v1484_v9  ;;  %v1775_v27 = vmul.f32 0.0051020407, %v1672_v50  ;;  %v2055_v42 = vsub.f32 %v1991_v62, %v2023_v33 }
 0x204   : > { %v2058_v39 = vsub.f32 %v1994_v52, %v2026_v36  ;;  %v1996_v52 = vld [vmem:[%s3870_s16 + $0x78] sm:$0xff]  ;;  %v2025_v56 = vmul.f32 %v1961_v34, %v3912_v60  ;;  %v1934_v62 = vld [vmem:[%s3853_s9 + $0x88] sm:$0xff] }
 0x205   : > { %3117 = vrsqrt.f32 %v1870_v29  ;;  %v1808_v10 = vmul.f32 %v3955_v14, %v3955_v14  ;;  %v1839_v9 = vsub.f32 %v1775_v27, %v1807_v28  ;;  %v1931_v28 = vld [vmem:[%s3853_s9 + $0x70] sm:$0xff] }
 0x206   : > { %v1676_v22 = vpop.xlane.xlu1 %1675  ;;  %v1488_v32 = vpop.xlane.xlu0 %1487  ;;  %2368 = vperm.xlu0 %2891, %v2058_v39   ;;  %2129 = vperm.xlu1 %2892, %v1959_v45   ;;  %3119 = vrsqrt.f32 %v1869_v47 }
 0x207   : > { %v3114_v40 = vpop.eup %3113  ;;  %v1776_v4 = vmul.f32 0.0051020407, %v1676_v22  ;;  %v3967_v39 = vmul.f32 0.0051020407, %v1488_v32  ;;  %v1871_v27 = vadd.f32 1e-05, %v1839_v9 }
 0x208   : > { %v1964_v58 = vmul.f32 %v3114_v40, %v1932_v38 }
 0x209   : > { %v1840_v63 = vsub.f32 %v1776_v4, %v1808_v10  ;;  %v3116_v10 = vpop.eup %3115  ;;  %v1809_v40 = vmul.f32 %v3967_v39, %v3967_v39 }
 0x20a   : > { %v1680_v36 = vpop.xlane.xlu0 %1679  ;;  %v1492_v29 = vpop.xlane.xlu1 %1491  ;;  %2154 = vperm.xlu0 %2891, %v1964_v58   ;;  %2353 = vperm.xlu1 %2892, %v2055_v42   ;;  %v2028_v50 = vmul.f32 %v1964_v58, %v3927_v1  ;;  %v2057_v58 = vsub.f32 %v1993_v15, %v2025_v56  ;;  %v1963_v42 = vmul.f32 %v3116_v10, %v1931_v28  ;;  %v1936_v15 = vld [vmem:[%s3853_s9 + $0x98] sm:$0xff]  ;;  %v1995_v28 = vld [vmem:[%s3870_s16 + $0x70] sm:$0xff] }
 0x20b   : > { %v1872_v45 = vadd.f32 1e-05, %v1840_v63  ;;  %v3969_v23 = vmul.f32 0.0051020407, %v1492_v29  ;;  %v1777_v47 = vmul.f32 0.0051020407, %v1680_v36 }
 0x20c   : > { %v2060_v33 = vsub.f32 %v1996_v52, %v2028_v50  ;;  %v1998_v52 = vld [vmem:[%s3870_s16 + $0x88] sm:$0xff]  ;;  %v2027_v10 = vmul.f32 %v1963_v42, %v3925_v0 }
 0x20d   : > { %3121 = vrsqrt.f32 %v1872_v45  ;;  %v1810_v38 = vmul.f32 %v3969_v23, %v3969_v23  ;;  %v1841_v50 = vsub.f32 %v1777_v47, %v1809_v40 }
 0x20e   : > { %v1684_v1 = vpop.xlane.xlu1 %1683  ;;  %v1496_v22 = vpop.xlane.xlu0 %1495  ;;  %2378 = vperm.xlu0 %2891, %v2060_v33   ;;  %2139 = vperm.xlu1 %2892, %v1961_v34   ;;  %3123 = vrsqrt.f32 %v1871_v27  ;;  %v1933_v27 = vld [vmem:[%s3853_s9 + $0x80] sm:$0xff] }
 0x20f   : > { %v3118_v32 = vpop.eup %3117  ;;  %v1778_v60 = vmul.f32 0.0051020407, %v1684_v1  ;;  %v3981_v33 = vmul.f32 0.0051020407, %v1496_v22 }
 0x210   : > { %v1966_v4 = vmul.f32 %v3118_v32, %v1934_v62  ;;  %v1873_v32 = vadd.f32 1e-05, %v1841_v50 }
 0x211   : > { %v1842_v63 = vsub.f32 %v1778_v60, %v1810_v38  ;;  %v3120_v38 = vpop.eup %3119  ;;  %v1811_v40 = vmul.f32 %v3981_v33, %v3981_v33 }
 0x212   : > { %v1688_v29 = vpop.xlane.xlu0 %1687  ;;  %v1500_v9 = vpop.xlane.xlu1 %1499  ;;  %2164 = vperm.xlu0 %2891, %v1966_v4   ;;  %2363 = vperm.xlu1 %2892, %v2057_v58   ;;  %v2030_v34 = vmul.f32 %v1966_v4, %v3941_v57  ;;  %v2059_v4 = vsub.f32 %v1995_v28, %v2027_v10  ;;  %v1965_v58 = vmul.f32 %v3120_v38, %v1933_v27  ;;  %v1938_v28 = vld [vmem:[%s3853_s9 + $0xa8] sm:$0xff]  ;;  %v1997_v27 = vld [vmem:[%s3870_s16 + $0x80] sm:$0xff] }
 0x213   : > { %v1874_v45 = vadd.f32 1e-05, %v1842_v63  ;;  %v3983_v36 = vmul.f32 0.0051020407, %v1500_v9  ;;  %v1779_v47 = vmul.f32 0.0051020407, %v1688_v29 }
 0x214   : > { %v2062_v56 = vsub.f32 %v1998_v52, %v2030_v34  ;;  %v2000_v52 = vld [vmem:[%s3870_s16 + $0x98] sm:$0xff] }
 0x215   : > { %3125 = vrsqrt.f32 %v1874_v45  ;;  %v1812_v62 = vmul.f32 %v3983_v36, %v3983_v36  ;;  %v1843_v50 = vsub.f32 %v1779_v47, %v1811_v40 }
 0x216   : > { %v1692_v1 = vpop.xlane.xlu1 %1691  ;;  %v1504_v57 = vpop.xlane.xlu0 %1503  ;;  %2388 = vperm.xlu0 %2891, %v2062_v56   ;;  %2149 = vperm.xlu1 %2892, %v1963_v42   ;;  %3127 = vrsqrt.f32 %v1873_v32 }
 0x217   : > { %v3122_v22 = vpop.eup %3121  ;;  %v1780_v0 = vmul.f32 0.0051020407, %v1692_v1  ;;  %v3994_v9 = vmul.f32 0.0051020407, %v1504_v57  ;;  %v1935_v1 = vld [vmem:[%s3853_s9 + $0x90] sm:$0xff] }
 0x218   : > { %v1968_v60 = vmul.f32 %v3122_v22, %v1936_v15  ;;  %v3124_v10 = vpop.eup %3123  ;;  %v1875_v47 = vadd.f32 1e-05, %v1843_v50 }
 0x219   : > { %v1844_v63 = vsub.f32 %v1780_v0, %v1812_v62  ;;  %v2029_v62 = vmul.f32 %v1965_v58, %v3939_v20 }
 0x21a   : > { %v1696_v34 = vpop.xlane.xlu0 %1695  ;;  %v1508_v45 = vpop.xlane.xlu1 %1507  ;;  %2174 = vperm.xlu0 %2891, %v1968_v60   ;;  %2373 = vperm.xlu1 %2892, %v2059_v4   ;;  %v2032_v42 = vmul.f32 %v1968_v60, %v3955_v14  ;;  %v1813_v14 = vmul.f32 %v3994_v9, %v3994_v9  ;;  %v1967_v4 = vmul.f32 %v3124_v10, %v1935_v1  ;;  %v1999_v1 = vld [vmem:[%s3870_s16 + $0x90] sm:$0xff] }
 0x21b   : > { %v1876_v29 = vadd.f32 1e-05, %v1844_v63  ;;  %v3997_v56 = vmul.f32 0.0051020407, %v1508_v45  ;;  %v1781_v57 = vmul.f32 0.0051020407, %v1696_v34  ;;  %v2061_v60 = vsub.f32 %v1997_v27, %v2029_v62 }
 0x21c   : > { %v2064_v38 = vsub.f32 %v2000_v52, %v2032_v42  ;;  %v2002_v52 = vld [vmem:[%s3870_s16 + $0xa8] sm:$0xff]  ;;  %v2031_v10 = vmul.f32 %v1967_v4, %v3952_v3  ;;  %v1940_v27 = vld [vmem:[%s3853_s9 + $0xb8] sm:$0xff] }
 0x21d   : > { %3129 = vrsqrt.f32 %v1876_v29  ;;  %v1814_v15 = vmul.f32 %v3997_v56, %v3997_v56  ;;  %v1845_v45 = vsub.f32 %v1781_v57, %v1813_v14  ;;  %v1937_v14 = vld [vmem:[%s3853_s9 + $0xa0] sm:$0xff] }
 0x21e   : > { %v1700_v22 = vpop.xlane.xlu1 %1699  ;;  %v1512_v32 = vpop.xlane.xlu0 %1511  ;;  %2398 = vperm.xlu0 %2891, %v2064_v38   ;;  %2159 = vperm.xlu1 %2892, %v1965_v58   ;;  %3131 = vrsqrt.f32 %v1875_v47 }
 0x21f   : > { %v3126_v40 = vpop.eup %3125  ;;  %v1782_v0 = vmul.f32 0.0051020407, %v1700_v22  ;;  %v4009_v38 = vmul.f32 0.0051020407, %v1512_v32  ;;  %v1877_v57 = vadd.f32 1e-05, %v1845_v45 }
 0x220   : > { %v1970_v20 = vmul.f32 %v3126_v40, %v1938_v28 }
 0x221   : > { %v1846_v63 = vsub.f32 %v1782_v0, %v1814_v15  ;;  %v3128_v15 = vpop.eup %3127  ;;  %v1815_v40 = vmul.f32 %v4009_v38, %v4009_v38 }
 0x222   : > { %v1704_v42 = vpop.xlane.xlu0 %1703  ;;  %v1516_v29 = vpop.xlane.xlu1 %1515  ;;  %2184 = vperm.xlu0 %2891, %v1970_v20   ;;  %2383 = vperm.xlu1 %2892, %v2061_v60   ;;  %v2034_v34 = vmul.f32 %v1970_v20, %v3969_v23  ;;  %v2063_v20 = vsub.f32 %v1999_v1, %v2031_v10  ;;  %v1969_v60 = vmul.f32 %v3128_v15, %v1937_v14  ;;  %v1942_v1 = vld [vmem:[%s3853_s9 + $0xc8] sm:$0xff]  ;;  %v2001_v14 = vld [vmem:[%s3870_s16 + $0xa0] sm:$0xff] }
 0x223   : > { %v1878_v58 = vadd.f32 1e-05, %v1846_v63  ;;  %v4011_v50 = vmul.f32 0.0051020407, %v1516_v29  ;;  %v1783_v47 = vmul.f32 0.0051020407, %v1704_v42 }
 0x224   : > { %v2066_v62 = vsub.f32 %v2002_v52, %v2034_v34  ;;  %v2004_v52 = vld [vmem:[%s3870_s16 + $0xb8] sm:$0xff]  ;;  %v2033_v15 = vmul.f32 %v1969_v60, %v3967_v39 }
 0x225   : > { %3133 = vrsqrt.f32 %v1878_v58  ;;  %v1816_v28 = vmul.f32 %v4011_v50, %v4011_v50  ;;  %v1847_v34 = vsub.f32 %v1783_v47, %v1815_v40 }
 0x226   : > { %v1708_v23 = vpop.xlane.xlu1 %1707  ;;  %v1520_v22 = vpop.xlane.xlu0 %1519  ;;  %2408 = vperm.xlu0 %2891, %v2066_v62   ;;  %2169 = vperm.xlu1 %2892, %v1967_v4   ;;  %3135 = vrsqrt.f32 %v1877_v57  ;;  %v1939_v57 = vld [vmem:[%s3853_s9 + $0xb0] sm:$0xff] }
 0x227   : > { %v3130_v32 = vpop.eup %3129  ;;  %v1784_v3 = vmul.f32 0.0051020407, %v1708_v23  ;;  %v4023_v62 = vmul.f32 0.0051020407, %v1520_v22 }
 0x228   : > { %v1972_v0 = vmul.f32 %v3130_v32, %v1940_v27  ;;  %v1879_v32 = vadd.f32 1e-05, %v1847_v34 }
 0x229   : > { %v1848_v63 = vsub.f32 %v1784_v3, %v1816_v28  ;;  %v3132_v28 = vpop.eup %3131  ;;  %v1817_v40 = vmul.f32 %v4023_v62, %v4023_v62 }
 0x22a   : > { %v1712_v29 = vpop.xlane.xlu0 %1711  ;;  %v1524_v45 = vpop.xlane.xlu1 %1523  ;;  %2194 = vperm.xlu0 %2891, %v1972_v0   ;;  %2393 = vperm.xlu1 %2892, %v2063_v20   ;;  %v2036_v4 = vmul.f32 %v1972_v0, %v3983_v36  ;;  %v2065_v0 = vsub.f32 %v2001_v14, %v2033_v15  ;;  %v1971_v20 = vmul.f32 %v3132_v28, %v1939_v57  ;;  %v1944_v14 = vld [vmem:[%s3853_s9 + $0xd8] sm:$0xff]  ;;  %v2003_v57 = vld [vmem:[%s3870_s16 + $0xb0] sm:$0xff] }
 0x22b   : > { %v1880_v58 = vadd.f32 1e-05, %v1848_v63  ;;  %v4025_v42 = vmul.f32 0.0051020407, %v1524_v45  ;;  %v1785_v47 = vmul.f32 0.0051020407, %v1712_v29 }
 0x22c   : > { %v2068_v10 = vsub.f32 %v2004_v52, %v2036_v4  ;;  %v2006_v52 = vld [vmem:[%s3870_s16 + $0xc8] sm:$0xff]  ;;  %v2035_v28 = vmul.f32 %v1971_v20, %v3981_v33 }
 0x22d   : > { %3137 = vrsqrt.f32 %v1880_v58  ;;  %v1818_v27 = vmul.f32 %v4025_v42, %v4025_v42  ;;  %v1849_v34 = vsub.f32 %v1785_v47, %v1817_v40 }
 0x22e   : > { %v1716_v23 = vpop.xlane.xlu1 %1715  ;;  %2418 = vperm.xlu0 %2891, %v2068_v10   ;;  %v1528_v36 = vpop.xlane.xlu0 %1527  ;;  %2179 = vperm.xlu1 %2892, %v1969_v60   ;;  %3139 = vrsqrt.f32 %v1879_v32  ;;  %v2067_v33 = vsub.f32 %v2003_v57, %v2035_v28  ;;  %v1943_v28 = vld [vmem:[%s3853_s9 + $0xd0] sm:$0xff] }
 0x22f   : > { %v3134_v22 = vpop.eup %3133  ;;  %v1786_v39 = vmul.f32 0.0051020407, %v1716_v23  ;;  %v4036_v45 = vmul.f32 0.0051020407, %v1528_v36  ;;  %v1941_v23 = vld [vmem:[%s3853_s9 + $0xc0] sm:$0xff] }
 0x230   : > { %v1974_v3 = vmul.f32 %v3134_v22, %v1942_v1  ;;  %v3136_v1 = vpop.eup %3135  ;;  %v1881_v40 = vadd.f32 1e-05, %v1849_v34 }
 0x231   : > { %v1850_v63 = vsub.f32 %v1786_v39, %v1818_v27  ;;  %v1819_v36 = vmul.f32 %v4036_v45, %v4036_v45 }
 0x232   : > { %2204 = vperm.xlu0 %2891, %v1974_v3   ;;  %2403 = vperm.xlu1 %2892, %v2065_v0   ;;  %v1532_v60 = vpop.xlane.xlu1 %1531  ;;  %v2038_v4 = vmul.f32 %v1974_v3, %v3997_v56  ;;  %v1720_v29 = vpop.xlane.xlu0 %1719  ;;  %v1973_v3 = vmul.f32 %v3136_v1, %v1941_v23  ;;  %v2010_v23 = vld [vmem:[%s3870_s16 + $0xe8] sm:$0xff] }
 0x233   : > { %v1882_v58 = vadd.f32 1e-05, %v1850_v63  ;;  %v1756_v10 = vmul.f32 0.0051020407, %v1532_v60  ;;  %v1787_v22 = vmul.f32 0.0051020407, %v1720_v29 }
 0x234   : > { %v2070_v15 = vsub.f32 %v2006_v52, %v2038_v4  ;;  %v2008_v63 = vld [vmem:[%s3870_s16 + $0xd8] sm:$0xff]  ;;  %v2037_v34 = vmul.f32 %v1973_v3, %v3994_v9  ;;  %v1946_v29 = vld [vmem:[%s3853_s9 + $0xe8] sm:$0xff] }
 0x235   : > { %3141 = vrsqrt.f32 %v1882_v58  ;;  %v1820_v27 = vmul.f32 %v1756_v10, %v1756_v10  ;;  %v1851_v52 = vsub.f32 %v1787_v22, %v1819_v36 }
 0x236   : > { %2428 = vperm.xlu0 %2891, %v2070_v15   ;;  %2189 = vperm.xlu1 %2892, %v1971_v20   ;;  %v1724_v56 = vpop.xlane.xlu1 %1723  ;;  %3143 = vrsqrt.f32 %v1881_v40  ;;  %v2005_v15 = vld [vmem:[%s3870_s16 + $0xc0] sm:$0xff]  ;;  %v1948_v40 = vld [vmem:[%s3853_s9 + $0xf8] sm:$0xff] }
 0x237   : > { %v3138_v32 = vpop.eup %3137  ;;  %v1788_v47 = vmul.f32 0.0051020407, %v1724_v56  ;;  %v1883_v1 = vadd.f32 1e-05, %v1851_v52 }
 0x238   : > { %v1976_v39 = vmul.f32 %v3138_v32, %v1944_v14  ;;  %v3140_v58 = vpop.eup %3139  ;;  %v2007_v32 = vld [vmem:[%s3870_s16 + $0xd0] sm:$0xff] }
 0x239   : > { %v1852_v0 = vsub.f32 %v1788_v47, %v1820_v27  ;;  %v1975_v57 = vmul.f32 %v3140_v58, %v1943_v28  ;;  %v1945_v47 = vld [vmem:[%s3853_s9 + $0xe0] sm:$0xff] }
 0x23a   : > { %2214 = vperm.xlu0 %2891, %v1976_v39   ;;  %2413 = vperm.xlu1 %2892, %v2067_v33   ;;  %v2040_v60 = vmul.f32 %v1976_v39, %v4011_v50  ;;  %v2069_v50 = vsub.f32 %v2005_v15, %v2037_v34 }
 0x23b   : > { %v1884_v20 = vadd.f32 1e-05, %v1852_v0  ;;  %v2039_v22 = vmul.f32 %v1975_v57, %v4009_v38 }
 0x23c   : > { %v2072_v4 = vsub.f32 %v2008_v63, %v2040_v60  ;;  %v2012_v63 = vld [vmem:[%s3870_s16 + $0xf8] sm:$0xff] }
 0x23d   : > { %3145 = vrsqrt.f32 %v1884_v20  ;;  %v2071_v33 = vsub.f32 %v2007_v32, %v2039_v22  ;;  %v1947_v20 = vld [vmem:[%s3853_s9 + $0xf0] sm:$0xff] }
 0x23e   : > { %2438 = vperm.xlu0 %2891, %v2072_v4   ;;  %2199 = vperm.xlu1 %2892, %v1973_v3   ;;  %3147 = vrsqrt.f32 %v1883_v1  ;;  %v2009_v4 = vld [vmem:[%s3870_s16 + $0xe0] sm:$0xff] }
 0x23f   : > { %v3142_v27 = vpop.eup %3141 }
 0x240   : > { %v1978_v14 = vmul.f32 %v3142_v27, %v1946_v29  ;;  %v3144_v56 = vpop.eup %3143 }
 0x241   : > { %v1977_v0 = vmul.f32 %v3144_v56, %v1945_v47 }
 0x242   : > { %2224 = vperm.xlu0 %2891, %v1978_v14   ;;  %2423 = vperm.xlu1 %2892, %v2069_v50   ;;  %v2042_v9 = vmul.f32 %v1978_v14, %v4025_v42  ;;  %v2011_v50 = vld [vmem:[%s3870_s16 + $0xf0] sm:$0xff] }
 0x243   : > { %v2041_v38 = vmul.f32 %v1977_v0, %v4023_v62 }
 0x244   : > { %v2074_v36 = vsub.f32 %v2010_v23, %v2042_v9 }
 0x245   : > { %v2073_v58 = vsub.f32 %v2009_v4, %v2041_v38 }
 0x246   : > { %2448 = vperm.xlu0 %2891, %v2074_v36   ;;  %2209 = vperm.xlu1 %2892, %v1975_v57  }
 0x247   : > { %v3146_v39 = vpop.eup %3145 }
 0x248   : > { %v1980_v3 = vmul.f32 %v3146_v39, %v1948_v40  ;;  %v3148_v42 = vpop.eup %3147 }
 0x249   : > { %v1979_v34 = vmul.f32 %v3148_v42, %v1947_v20 }
 0x24a   : > { %2433 = vperm.xlu1 %2892, %v2071_v33   ;;  %2234 = vperm.xlu0 %2891, %v1980_v3   ;;  %v2044_v52 = vmul.f32 %v1980_v3, %v1756_v10 }
 0x24b   : > { %v2043_v28 = vmul.f32 %v1979_v34, %v4036_v45 }
 0x24c   : > { %v2076_v60 = vsub.f32 %v2012_v63, %v2044_v52 }
 0x24e   : > { %2219 = vperm.xlu1 %2892, %v1977_v0   ;;  %2458 = vperm.xlu0 %2891, %v2076_v60  }
 0x24f   : > { %v2085_v29 = vpop.permute.xlu1 %2084 }
 0x250   : > { %v2239_v1 = vmul.f32 %v2085_v29, %v3463_v8  ;;  %v2240_v10 = vmul.f32 %v2085_v29, %v3465_v11 }
 0x251   : > { %v2080_v15 = vpop.permute.xlu0 %2079 }
 0x252   : > { %2443 = vperm.xlu1 %2892, %v2073_v58   ;;  %v2237_v27 = vmul.f32 %v2080_v15, %v3459_v2  ;;  %v2238_v62 = vmul.f32 %v2080_v15, %v3461_v5  ;;  %v2075_v2 = vsub.f32 %v2011_v50, %v2043_v28 }
 0x255   : > { %v2309_v14 = vpop.permute.xlu0 %2308  ;;  %v2304_v45 = vpop.permute.xlu1 %2303 }
 0x256   : > { %v2463_v8 = vadd.f32 %v2309_v14, %v2239_v1  ;;  %v2464_v57 = vadd.f32 %v2309_v14, %v2240_v10  ;;  %v2461_v11 = vadd.f32 %v2304_v45, %v2237_v27  ;;  %v2462_v23 = vadd.f32 %v2304_v45, %v2238_v62  ;;  %2229 = vperm.xlu1 %2892, %v1979_v34  }
 0x258   : > { %2527 = vst [vmem:[%s4071_s17 + $0x10] sm:$0xff] %v2463_v8  ;;  %2528 = vst.msk [vmem:[%s4071_s17 + $0x18] sm:$0xff] %vm1404_vm0, %v2464_v57 }
 0x259   : > { %2525 = vst [vmem:[%s4071_s17] sm:$0xff] %v2461_v11  ;;  %2526 = vst.msk [vmem:[%s4071_s17 + $0x8] sm:$0xff] %vm1404_vm0, %v2462_v23  ;;  %v2090_v5 = vpop.permute.xlu1 %2089 }
 0x25a   : > { %2453 = vperm.xlu1 %2892, %v2075_v2   ;;  %v2241_v32 = vmul.f32 %v2090_v5, %v3479_v21  ;;  %v2242_v40 = vmul.f32 %v2090_v5, %v3482_v26 }
 0x25d   : > { %v2095_v9 = vpop.permute.xlu1 %2094  ;;  %v2319_v56 = vpop.permute.xlu0 %2318 }
 0x25e   : > { %v2243_v36 = vmul.f32 %v2095_v9, %v3485_v30  ;;  %v2244_v22 = vmul.f32 %v2095_v9, %v3491_v35 }
 0x260   : > { %v2467_v47 = vadd.f32 %v2319_v56, %v2243_v36  ;;  %v2468_v39 = vadd.f32 %v2319_v56, %v2244_v22 }
 0x261   : > { %v2314_v33 = vpop.permute.xlu1 %2313 }
 0x262   : > { %2531 = vst [vmem:[%s4071_s17 + $0x30] sm:$0xff] %v2467_v47  ;;  %2532 = vst.msk [vmem:[%s4071_s17 + $0x38] sm:$0xff] %vm1404_vm0, %v2468_v39  ;;  %v2465_v3 = vadd.f32 %v2314_v33, %v2241_v32  ;;  %v2466_v0 = vadd.f32 %v2314_v33, %v2242_v40 }
 0x264   : > { %2529 = vst [vmem:[%s4071_s17 + $0x20] sm:$0xff] %v2465_v3  ;;  %2530 = vst.msk [vmem:[%s4071_s17 + $0x28] sm:$0xff] %vm1404_vm0, %v2466_v0 }
 0x265   : > { %v2100_v30 = vpop.permute.xlu1 %2099  ;;  %v2329_v35 = vpop.permute.xlu0 %2328 }
 0x266   : > { %v2245_v52 = vmul.f32 %v2100_v30, %v3503_v46  ;;  %v2246_v42 = vmul.f32 %v2100_v30, %v3508_v51 }
 0x269   : > { %v2105_v21 = vpop.permute.xlu1 %2104 }
 0x26a   : > { %v2247_v26 = vmul.f32 %v2105_v21, %v3511_v55  ;;  %v2248_v63 = vmul.f32 %v2105_v21, %v3515_v59 }
 0x26c   : > { %v2471_v60 = vadd.f32 %v2329_v35, %v2247_v26  ;;  %v2472_v38 = vadd.f32 %v2329_v35, %v2248_v63 }
 0x26d   : > { %v2339_v20 = vpop.permute.xlu0 %2338  ;;  %v2324_v4 = vpop.permute.xlu1 %2323 }
 0x26e   : > { %2535 = vst [vmem:[%s4071_s17 + $0x50] sm:$0xff] %v2471_v60  ;;  %2536 = vst.msk [vmem:[%s4071_s17 + $0x58] sm:$0xff] %vm1404_vm0, %v2472_v38  ;;  %v2469_v34 = vadd.f32 %v2324_v4, %v2245_v52  ;;  %v2470_v58 = vadd.f32 %v2324_v4, %v2246_v42 }
 0x270   : > { %2533 = vst [vmem:[%s4071_s17 + $0x40] sm:$0xff] %v2469_v34  ;;  %2534 = vst.msk [vmem:[%s4071_s17 + $0x48] sm:$0xff] %vm1404_vm0, %v2470_v58 }
 0x271   : > { %v2125_v55 = vpop.permute.xlu0 %2124  ;;  %v2110_v59 = vpop.permute.xlu1 %2109 }
 0x272   : > { %v2255_v46 = vmul.f32 %v2125_v55, %v3559_v48  ;;  %v2256_v51 = vmul.f32 %v2125_v55, %v3563_v54  ;;  %v2249_v62 = vmul.f32 %v2110_v59, %v3531_v13  ;;  %v2250_v14 = vmul.f32 %v2110_v59, %v3533_v16  ;;  %v4303_v55 = vld [vmem:[#allocation3_spill] sm:$0xff] }
 0x275   : > { %v2349_v29 = vpop.permute.xlu0 %2348  ;;  %v2115_v15 = vpop.permute.xlu1 %2114 }
 0x276   : > { %v2479_v28 = vadd.f32 %v2349_v29, %v2255_v46  ;;  %v2480_v1 = vadd.f32 %v2349_v29, %v2256_v51  ;;  %v2251_v10 = vmul.f32 %v2115_v15, %v3535_v19  ;;  %v2252_v27 = vmul.f32 %v2115_v15, %v3539_v25  ;;  %v4304_v29 = vld [vmem:[#allocation8_spill] sm:$0xff] }
 0x278   : > { %2543 = vst [vmem:[%s4071_s17 + $0x90] sm:$0xff] %v2479_v28  ;;  %2544 = vst.msk [vmem:[%s4071_s17 + $0x98] sm:$0xff] %vm1404_vm0, %v2480_v1  ;;  %v2475_v48 = vadd.f32 %v2339_v20, %v2251_v10  ;;  %v2476_v54 = vadd.f32 %v2339_v20, %v2252_v27  ;;  %v4305_v28 = vld [vmem:[#allocation9_spill] sm:$0xff] }
 0x279   : > { %v2135_v45 = vpop.permute.xlu0 %2134  ;;  %v2334_v50 = vpop.permute.xlu1 %2333 }
 0x27a   : > { %2539 = vst [vmem:[%s4071_s17 + $0x70] sm:$0xff] %v2475_v48  ;;  %2540 = vst.msk [vmem:[%s4071_s17 + $0x78] sm:$0xff] %vm1404_vm0, %v2476_v54  ;;  %v2473_v19 = vadd.f32 %v2334_v50, %v2249_v62  ;;  %v2474_v8 = vadd.f32 %v2334_v50, %v2250_v14  ;;  %v2259_v25 = vmul.f32 %v2135_v45, %v3583_v17  ;;  %v4306_v48 = vld [vmem:[#allocation4_spill] sm:$0xff] }
 0x27b   : > { %v2260_v13 = vmul.f32 %v2135_v45, %v3587_v24  ;;  %v4307_v45 = vld [vmem:[#allocation5_spill] sm:$0xff] }
 0x27c   : > { %2537 = vst [vmem:[%s4071_s17 + $0x60] sm:$0xff] %v2473_v19  ;;  %2538 = vst.msk [vmem:[%s4071_s17 + $0x68] sm:$0xff] %vm1404_vm0, %v2474_v8 }
 0x27d   : > { %v2359_v16 = vpop.permute.xlu0 %2358  ;;  %v2120_v57 = vpop.permute.xlu1 %2119 }
 0x27e   : > { %v2483_v11 = vadd.f32 %v2359_v16, %v2259_v25  ;;  %v2484_v23 = vadd.f32 %v2359_v16, %v2260_v13  ;;  %v2253_v2 = vmul.f32 %v2120_v57, %v3555_v41  ;;  %v2254_v17 = vmul.f32 %v2120_v57, %v3557_v44  ;;  %v4308_v16 = vld [vmem:[#allocation12_spill] sm:$0xff] }
 0x280   : > { %2547 = vst [vmem:[%s4071_s17 + $0xb0] sm:$0xff] %v2483_v11  ;;  %2548 = vst.msk [vmem:[%s4071_s17 + $0xb8] sm:$0xff] %vm1404_vm0, %v2484_v23  ;;  %v4309_v11 = vld [vmem:[#allocation13_spill] sm:$0xff] }
 0x281   : > { %v2145_v5 = vpop.permute.xlu0 %2144  ;;  %v2344_v24 = vpop.permute.xlu1 %2343 }
 0x282   : > { %v2477_v9 = vadd.f32 %v2344_v24, %v2253_v2  ;;  %v2478_v36 = vadd.f32 %v2344_v24, %v2254_v17  ;;  %v2263_v22 = vmul.f32 %v2145_v5, %v3607_v53  ;;  %v2264_v56 = vmul.f32 %v2145_v5, %v3611_v61 }
 0x284   : > { %2541 = vst [vmem:[%s4071_s17 + $0x80] sm:$0xff] %v2477_v9  ;;  %2542 = vst.msk [vmem:[%s4071_s17 + $0x88] sm:$0xff] %vm1404_vm0, %v2478_v36  ;;  %v4310_v9 = vld [vmem:[#allocation6_spill] sm:$0xff] }
 0x285   : > { %v2369_v32 = vpop.permute.xlu0 %2368  ;;  %v2130_v40 = vpop.permute.xlu1 %2129 }
 0x286   : > { %v2487_v47 = vadd.f32 %v2369_v32, %v2263_v22  ;;  %v2488_v39 = vadd.f32 %v2369_v32, %v2264_v56  ;;  %v2257_v41 = vmul.f32 %v2130_v40, %v3579_v7  ;;  %v2258_v44 = vmul.f32 %v2130_v40, %v3581_v12  ;;  %v4311_v22 = vld [vmem:[#allocation7_spill] sm:$0xff] }
 0x288   : > { %2551 = vst [vmem:[%s4071_s17 + $0xd0] sm:$0xff] %v2487_v47  ;;  %2552 = vst.msk [vmem:[%s4071_s17 + $0xd8] sm:$0xff] %vm1404_vm0, %v2488_v39 }
 0x289   : > { %v2155_v53 = vpop.permute.xlu0 %2154  ;;  %v2354_v61 = vpop.permute.xlu1 %2353 }
 0x28a   : > { %v2481_v33 = vadd.f32 %v2354_v61, %v2257_v41  ;;  %v2482_v3 = vadd.f32 %v2354_v61, %v2258_v44  ;;  %v2267_v0 = vmul.f32 %v2155_v53, %v3631_v31  ;;  %v2268_v30 = vmul.f32 %v2155_v53, %v3635_v37  ;;  %v4312_v41 = vld [vmem:[#allocation16_spill] sm:$0xff]  ;;  %v4313_v53 = vld [vmem:[#allocation17_spill] sm:$0xff] }
 0x28c   : > { %2545 = vst [vmem:[%s4071_s17 + $0xa0] sm:$0xff] %v2481_v33  ;;  %2546 = vst.msk [vmem:[%s4071_s17 + $0xa8] sm:$0xff] %vm1404_vm0, %v2482_v3 }
 0x28d   : > { %v2379_v35 = vpop.permute.xlu0 %2378  ;;  %v2140_v21 = vpop.permute.xlu1 %2139 }
 0x28e   : > { %v2491_v26 = vadd.f32 %v2379_v35, %v2267_v0  ;;  %v2492_v63 = vadd.f32 %v2379_v35, %v2268_v30  ;;  %v2261_v7 = vmul.f32 %v2140_v21, %v3603_v43  ;;  %v2262_v12 = vmul.f32 %v2140_v21, %v3605_v49  ;;  %v4302_v43 = vld [vmem:[#allocation2_spill] sm:$0xff] }
 0x28f   : > { %v4314_v35 = vld [vmem:[#allocation10_spill] sm:$0xff] }
 0x290   : > { %2555 = vst [vmem:[%s4071_s17 + $0xf0] sm:$0xff] %v2491_v26  ;;  %2556 = vst.msk [vmem:[%s4071_s17 + $0xf8] sm:$0xff] %vm1404_vm0, %v2492_v63  ;;  %v4315_v26 = vld [vmem:[#allocation11_spill] sm:$0xff] }
 0x291   : > { %v2165_v31 = vpop.permute.xlu0 %2164  ;;  %v2364_v37 = vpop.permute.xlu1 %2363 }
 0x292   : > { %v2485_v52 = vadd.f32 %v2364_v37, %v2261_v7  ;;  %v2486_v42 = vadd.f32 %v2364_v37, %v2262_v12  ;;  %v2271_v60 = vmul.f32 %v2165_v31, %v3655_v6  ;;  %v2272_v38 = vmul.f32 %v2165_v31, %v3659_v18 }
 0x294   : > { %2549 = vst [vmem:[%s4071_s17 + $0xc0] sm:$0xff] %v2485_v52  ;;  %2550 = vst.msk [vmem:[%s4071_s17 + $0xc8] sm:$0xff] %vm1404_vm0, %v2486_v42  ;;  %v4316_v52 = vld [vmem:[#allocation20_spill] sm:$0xff] }
 0x295   : > { %v2389_v20 = vpop.permute.xlu0 %2388  ;;  %v2150_v4 = vpop.permute.xlu1 %2149 }
 0x296   : > { %v2495_v34 = vadd.f32 %v2389_v20, %v2271_v60  ;;  %v2496_v58 = vadd.f32 %v2389_v20, %v2272_v38  ;;  %v2265_v49 = vmul.f32 %v2150_v4, %v4302_v43  ;;  %v2266_v6 = vmul.f32 %v2150_v4, %v4303_v55  ;;  %v4317_v60 = vld [vmem:[#allocation21_spill] sm:$0xff]  ;;  %v4318_v43 = vld [vmem:[#allocation14_spill] sm:$0xff]  ;;  %v4319_v55 = vld [vmem:[#allocation15_spill] sm:$0xff] }
 0x298   : > { %2559 = vst [vmem:[%s4071_s17 + $0x110] sm:$0xff] %v2495_v34  ;;  %2560 = vst.msk [vmem:[%s4071_s17 + $0x118] sm:$0xff] %vm1404_vm0, %v2496_v58 }
 0x299   : > { %v2175_v59 = vpop.permute.xlu0 %2174  ;;  %v2374_v18 = vpop.permute.xlu1 %2373 }
 0x29a   : > { %v2489_v46 = vadd.f32 %v2374_v18, %v2265_v49  ;;  %v2490_v51 = vadd.f32 %v2374_v18, %v2266_v6  ;;  %v2275_v15 = vmul.f32 %v2175_v59, %v4304_v29  ;;  %v2276_v1 = vmul.f32 %v2175_v59, %v4305_v28  ;;  %v4320_v29 = vld [vmem:[#allocation24_spill] sm:$0xff]  ;;  %v4321_v28 = vld [vmem:[#allocation25_spill] sm:$0xff] }
 0x29c   : > { %2553 = vst [vmem:[%s4071_s17 + $0xe0] sm:$0xff] %v2489_v46  ;;  %2554 = vst.msk [vmem:[%s4071_s17 + $0xe8] sm:$0xff] %vm1404_vm0, %v2490_v51 }
 0x29d   : > { %v2399_v10 = vpop.permute.xlu0 %2398  ;;  %v2160_v27 = vpop.permute.xlu1 %2159 }
 0x29e   : > { %v2499_v62 = vadd.f32 %v2399_v10, %v2275_v15  ;;  %v2500_v14 = vadd.f32 %v2399_v10, %v2276_v1  ;;  %v2269_v54 = vmul.f32 %v2160_v27, %v4306_v48  ;;  %v2270_v50 = vmul.f32 %v2160_v27, %v4307_v45  ;;  %v4322_v48 = vld [vmem:[#allocation18_spill] sm:$0xff]  ;;  %v4323_v45 = vld [vmem:[#allocation19_spill] sm:$0xff] }
 0x2a0   : > { %2563 = vst [vmem:[%s4071_s17 + $0x130] sm:$0xff] %v2499_v62  ;;  %2564 = vst.msk [vmem:[%s4071_s17 + $0x138] sm:$0xff] %vm1404_vm0, %v2500_v14 }
 0x2a1   : > { %v2185_v19 = vpop.permute.xlu0 %2184  ;;  %v2384_v8 = vpop.permute.xlu1 %2383 }
 0x2a2   : > { %v2493_v25 = vadd.f32 %v2384_v8, %v2269_v54  ;;  %v2494_v13 = vadd.f32 %v2384_v8, %v2270_v50  ;;  %v2279_v57 = vmul.f32 %v2185_v19, %v4308_v16  ;;  %v2280_v23 = vmul.f32 %v2185_v19, %v4309_v11  ;;  %v4324_v16 = vld [vmem:[#allocation28_spill] sm:$0xff]  ;;  %v4325_v11 = vld [vmem:[#allocation29_spill] sm:$0xff] }
 0x2a4   : > { %2557 = vst [vmem:[%s4071_s17 + $0x100] sm:$0xff] %v2493_v25  ;;  %2558 = vst.msk [vmem:[%s4071_s17 + $0x108] sm:$0xff] %vm1404_vm0, %v2494_v13 }
 0x2a5   : > { %v2409_v2 = vpop.permute.xlu0 %2408  ;;  %v2170_v17 = vpop.permute.xlu1 %2169 }
 0x2a6   : > { %v2503_v5 = vadd.f32 %v2409_v2, %v2279_v57  ;;  %v2504_v24 = vadd.f32 %v2409_v2, %v2280_v23  ;;  %v2273_v36 = vmul.f32 %v2170_v17, %v4310_v9  ;;  %v2274_v56 = vmul.f32 %v2170_v17, %v4311_v22  ;;  %v4326_v9 = vld [vmem:[#allocation22_spill] sm:$0xff]  ;;  %v4327_v22 = vld [vmem:[#allocation23_spill] sm:$0xff] }
 0x2a8   : > { %2567 = vst [vmem:[%s4071_s17 + $0x150] sm:$0xff] %v2503_v5  ;;  %2568 = vst.msk [vmem:[%s4071_s17 + $0x158] sm:$0xff] %vm1404_vm0, %v2504_v24 }
 0x2a9   : > { %v2195_v32 = vpop.permute.xlu0 %2194  ;;  %v2394_v40 = vpop.permute.xlu1 %2393 }
 0x2aa   : > { %v2497_v47 = vadd.f32 %v2394_v40, %v2273_v36  ;;  %v2498_v39 = vadd.f32 %v2394_v40, %v2274_v56  ;;  %v2283_v44 = vmul.f32 %v2195_v32, %v4312_v41  ;;  %v2284_v61 = vmul.f32 %v2195_v32, %v4313_v53  ;;  %v4328_v41 = vld [vmem:[#allocation32_spill] sm:$0xff]  ;;  %v4329_v53 = vld [vmem:[#allocation33_spill] sm:$0xff] }
 0x2ac   : > { %2561 = vst [vmem:[%s4071_s17 + $0x120] sm:$0xff] %v2497_v47  ;;  %2562 = vst.msk [vmem:[%s4071_s17 + $0x128] sm:$0xff] %vm1404_vm0, %v2498_v39 }
 0x2ad   : > { %v2419_v33 = vpop.permute.xlu0 %2418  ;;  %v2180_v3 = vpop.permute.xlu1 %2179 }
 0x2ae   : > { %v2507_v0 = vadd.f32 %v2419_v33, %v2283_v44  ;;  %v2508_v30 = vadd.f32 %v2419_v33, %v2284_v61  ;;  %v2277_v21 = vmul.f32 %v2180_v3, %v4314_v35  ;;  %v2278_v63 = vmul.f32 %v2180_v3, %v4315_v26  ;;  %v4330_v35 = vld [vmem:[#allocation26_spill] sm:$0xff]  ;;  %v4331_v26 = vld [vmem:[#allocation27_spill] sm:$0xff] }
 0x2b0   : > { %2571 = vst [vmem:[%s4071_s17 + $0x170] sm:$0xff] %v2507_v0  ;;  %2572 = vst.msk [vmem:[%s4071_s17 + $0x178] sm:$0xff] %vm1404_vm0, %v2508_v30 }
 0x2b1   : > { %v2205_v7 = vpop.permute.xlu0 %2204  ;;  %v2404_v12 = vpop.permute.xlu1 %2403 }
 0x2b2   : > { %v2501_v31 = vadd.f32 %v2404_v12, %v2277_v21  ;;  %v2502_v37 = vadd.f32 %v2404_v12, %v2278_v63  ;;  %v2287_v42 = vmul.f32 %v2205_v7, %v4316_v52  ;;  %v2288_v38 = vmul.f32 %v2205_v7, %v4317_v60  ;;  %v4332_v52 = vld [vmem:[#allocation30_spill] sm:$0xff]  ;;  %v4333_v60 = vld [vmem:[#allocation31_spill] sm:$0xff] }
 0x2b4   : > { %2565 = vst [vmem:[%s4071_s17 + $0x140] sm:$0xff] %v2501_v31  ;;  %2566 = vst.msk [vmem:[%s4071_s17 + $0x148] sm:$0xff] %vm1404_vm0, %v2502_v37 }
 0x2b5   : > { %v2429_v20 = vpop.permute.xlu0 %2428  ;;  %v2190_v4 = vpop.permute.xlu1 %2189 }
 0x2b6   : > { %v2511_v34 = vadd.f32 %v2429_v20, %v2287_v42  ;;  %v2512_v58 = vadd.f32 %v2429_v20, %v2288_v38  ;;  %v2281_v49 = vmul.f32 %v2190_v4, %v4318_v43  ;;  %v2282_v6 = vmul.f32 %v2190_v4, %v4319_v55 }
 0x2b8   : > { %2575 = vst [vmem:[%s4071_s17 + $0x190] sm:$0xff] %v2511_v34  ;;  %2576 = vst.msk [vmem:[%s4071_s17 + $0x198] sm:$0xff] %vm1404_vm0, %v2512_v58 }
 0x2b9   : > { %v2215_v59 = vpop.permute.xlu0 %2214  ;;  %v2414_v18 = vpop.permute.xlu1 %2413 }
 0x2ba   : > { %v2505_v46 = vadd.f32 %v2414_v18, %v2281_v49  ;;  %v2506_v51 = vadd.f32 %v2414_v18, %v2282_v6  ;;  %v2291_v15 = vmul.f32 %v2215_v59, %v4320_v29  ;;  %v2292_v1 = vmul.f32 %v2215_v59, %v4321_v28 }
 0x2bc   : > { %2569 = vst [vmem:[%s4071_s17 + $0x160] sm:$0xff] %v2505_v46  ;;  %2570 = vst.msk [vmem:[%s4071_s17 + $0x168] sm:$0xff] %vm1404_vm0, %v2506_v51 }
 0x2bd   : > { %v2439_v10 = vpop.permute.xlu0 %2438  ;;  %v2200_v27 = vpop.permute.xlu1 %2199 }
 0x2be   : > { %v2515_v62 = vadd.f32 %v2439_v10, %v2291_v15  ;;  %v2516_v14 = vadd.f32 %v2439_v10, %v2292_v1  ;;  %v2285_v54 = vmul.f32 %v2200_v27, %v4322_v48  ;;  %v2286_v50 = vmul.f32 %v2200_v27, %v4323_v45 }
 0x2c0   : > { %2579 = vst [vmem:[%s4071_s17 + $0x1b0] sm:$0xff] %v2515_v62  ;;  %2580 = vst.msk [vmem:[%s4071_s17 + $0x1b8] sm:$0xff] %vm1404_vm0, %v2516_v14 }
 0x2c1   : > { %v2225_v19 = vpop.permute.xlu0 %2224  ;;  %v2424_v8 = vpop.permute.xlu1 %2423 }
 0x2c2   : > { %v2509_v25 = vadd.f32 %v2424_v8, %v2285_v54  ;;  %v2510_v13 = vadd.f32 %v2424_v8, %v2286_v50  ;;  %v2295_v57 = vmul.f32 %v2225_v19, %v4324_v16  ;;  %v2296_v23 = vmul.f32 %v2225_v19, %v4325_v11 }
 0x2c4   : > { %2573 = vst [vmem:[%s4071_s17 + $0x180] sm:$0xff] %v2509_v25  ;;  %2574 = vst.msk [vmem:[%s4071_s17 + $0x188] sm:$0xff] %vm1404_vm0, %v2510_v13 }
 0x2c5   : > { %v2449_v2 = vpop.permute.xlu0 %2448  ;;  %v2210_v17 = vpop.permute.xlu1 %2209 }
 0x2c6   : > { %v2519_v5 = vadd.f32 %v2449_v2, %v2295_v57  ;;  %v2520_v24 = vadd.f32 %v2449_v2, %v2296_v23  ;;  %v2289_v36 = vmul.f32 %v2210_v17, %v4326_v9  ;;  %v2290_v56 = vmul.f32 %v2210_v17, %v4327_v22 }
 0x2c8   : > { %2583 = vst [vmem:[%s4071_s17 + $0x1d0] sm:$0xff] %v2519_v5  ;;  %2584 = vst.msk [vmem:[%s4071_s17 + $0x1d8] sm:$0xff] %vm1404_vm0, %v2520_v24 }
 0x2c9   : > { %v2235_v32 = vpop.permute.xlu0 %2234  ;;  %v2434_v40 = vpop.permute.xlu1 %2433 }
 0x2ca   : > { %v2513_v47 = vadd.f32 %v2434_v40, %v2289_v36  ;;  %v2514_v39 = vadd.f32 %v2434_v40, %v2290_v56  ;;  %v2299_v44 = vmul.f32 %v2235_v32, %v4328_v41  ;;  %v2300_v61 = vmul.f32 %v2235_v32, %v4329_v53 }
 0x2cc   : > { %2577 = vst [vmem:[%s4071_s17 + $0x1a0] sm:$0xff] %v2513_v47  ;;  %2578 = vst.msk [vmem:[%s4071_s17 + $0x1a8] sm:$0xff] %vm1404_vm0, %v2514_v39 }
 0x2cd   : > { %v2459_v33 = vpop.permute.xlu0 %2458  ;;  %v2220_v3 = vpop.permute.xlu1 %2219 }
 0x2ce   : > { %v2523_v0 = vadd.f32 %v2459_v33, %v2299_v44  ;;  %v2524_v30 = vadd.f32 %v2459_v33, %v2300_v61  ;;  %v2293_v21 = vmul.f32 %v2220_v3, %v4330_v35  ;;  %v2294_v63 = vmul.f32 %v2220_v3, %v4331_v26 }
 0x2d0   : > { %2587 = vst [vmem:[%s4071_s17 + $0x1f0] sm:$0xff] %v2523_v0  ;;  %2588 = vst.msk [vmem:[%s4071_s17 + $0x1f8] sm:$0xff] %vm1404_vm0, %v2524_v30 }
 0x2d1   : > { %v2444_v7 = vpop.permute.xlu1 %2443 }
 0x2d2   : > { %v2517_v12 = vadd.f32 %v2444_v7, %v2293_v21  ;;  %v2518_v31 = vadd.f32 %v2444_v7, %v2294_v63 }
 0x2d4   : > { %2581 = vst [vmem:[%s4071_s17 + $0x1c0] sm:$0xff] %v2517_v12  ;;  %2582 = vst.msk [vmem:[%s4071_s17 + $0x1c8] sm:$0xff] %vm1404_vm0, %v2518_v31 }
 0x2d5   : > { %v2230_v37 = vpop.permute.xlu1 %2229 }
 0x2d6   : > { %v2297_v42 = vmul.f32 %v2230_v37, %v4332_v52  ;;  %v2298_v38 = vmul.f32 %v2230_v37, %v4333_v60 }
 0x2d9   : > { %v2454_v20 = vpop.permute.xlu1 %2453 }
 0x2da   : > { %v2521_v4 = vadd.f32 %v2454_v20, %v2297_v42  ;;  %v2522_v34 = vadd.f32 %v2454_v20, %v2298_v38 }
 0x2dc   : > { %2585 = vst [vmem:[%s4071_s17 + $0x1e0] sm:$0xff] %v2521_v4  ;;  %2586 = vst.msk [vmem:[%s4071_s17 + $0x1e8] sm:$0xff] %vm1404_vm0, %v2522_v34 }
 0x2dd PF: > { %s14_s15 = sadd.s32 1, %s3155_s15  }
 0x2de   : > { %p11_p4 = scmp.ge.s32.totalorder %s14_s15, 6  }
 0x2e0   :  { %13 = sbr.rel (!%p11_p4) target bundleno = 1 (0x1), region = 72 }

</bundles_post_ra>
